<compile_context>
chip_gen: v7x
topology: tpu7x:2x2x1
jax: 0.10.0
libtpu: 0.0.40
codegen_flags: <defaults>
</compile_context>

<pallas_src>
import functools

import jax
import jax.numpy as jnp
from jax.experimental import pallas as pl
from jax.experimental.pallas import tpu as pltpu


def _round_up(x, m):
    return ((x + m - 1) // m) * m


def _vq_kernel(x_ref, et_ref, e_ref, esq_ref, q_ref, idx_ref, loss_ref, *,
               n_valid, needs_mask):
    x = x_ref[...]            # (TN, D)  f32 latent rows for this grid step
    e_t = et_ref[...]         # (D, Kp)  f32 codebook, pre-transposed (resident)
    e = e_ref[...]            # (Kp, D)  f32 codebook for the gather (resident)
    e_sq = esq_ref[...]       # (1, Kp)  f32 ||e_j||^2, 1e30 on padded codes

    tn, _ = x.shape
    kp = e.shape[0]

    # Distances up to the per-row constant ||x_i||^2 (irrelevant for argmin):
    #   dist[i, j] = ||e_j||^2 - 2 <x_i, e_j>
    xe = jnp.dot(x, e_t, preferred_element_type=jnp.float32)        # MXU (TN, Kp)
    dist = e_sq - 2.0 * xe

    # First-occurrence argmin over codes (same tie-break as torch.argmin).
    # min + iota + min is used instead of jnp.argmin so the reduction lowers
    # on every Mosaic toolchain; both reduces are XLU work with slack here.
    col = jax.lax.broadcasted_iota(jnp.int32, (tn, kp), 1)
    min_d = jnp.min(dist, axis=1, keepdims=True)                    # (TN, 1)
    masked_col = jnp.where(dist == min_d, col, kp)                  # (TN, Kp)
    inds = jnp.min(masked_col, axis=1, keepdims=True)               # (TN, 1) i32

    # One-hot of the *first* minimum only, then gather via the MXU.
    one_hot = (masked_col == inds).astype(jnp.float32)              # (TN, Kp)
    quantized = jnp.dot(one_hot, e, preferred_element_type=jnp.float32)

    # Per-block partial sum of squared error (padded rows masked out); the
    # wrapper divides by N*D once and applies (1 + beta).
    diff = quantized - x
    sq = diff * diff
    if needs_mask:
        row0 = pl.program_id(0) * tn
        rows = row0 + jax.lax.broadcasted_iota(jnp.int32, (tn, 1), 0)
        sq = jnp.where(rows < n_valid, sq, 0.0)
    part = jnp.sum(sq)

    q_ref[...] = quantized
    idx_ref[...] = inds
    # Lane-dense, (8,128)-aligned partial-loss slab (value replicated).
    loss_ref[...] = jnp.full((8, 128), part, dtype=jnp.float32)


def vector_quantizer_forward(latents_nchw, embedding, beta=0.25,
                             block_rows=None):
    """latents_nchw: (B, D, H, W) float32; embedding: (K, D) float32."""
    B, D, H, W = latents_nchw.shape
    K, D_e = embedding.shape
    assert D_e == D
    N = B * H * W

    # NCHW -> NHWC -> (N, D) so D is the lane (last) axis.
    # NOTE: these permutes are left to XLA here; for very large latents they
    # could be fused into the kernel (read (1, D, tH, W) blocks + in-kernel
    # transpose) to save one HBM round-trip.
    flat = jnp.transpose(latents_nchw, (0, 2, 3, 1)).reshape(N, D)
    flat = flat.astype(jnp.float32)

    # Pad the codebook along K to a lane-aligned (multiple-of-128) width so the
    # distance matmul output and the argmin run on full lanes.  Padded codes
    # get a huge squared norm so they can never win the argmin; their rows are
    # zero so the gather is unaffected.
    K_pad = _round_up(max(K, 128), 128)
    e = embedding.astype(jnp.float32)
    e_pad = jnp.zeros((K_pad, D), jnp.float32).at[:K, :].set(e)
    e_t_pad = e_pad.T                                   # (D, K_pad) for x @ e^T
    e_sq_pad = jnp.full((1, K_pad), 1e30, jnp.float32)
    e_sq_pad = e_sq_pad.at[0, :K].set(jnp.sum(e * e, axis=1))

    # Row tile: largest multiple of 128 whose per-step working set (dist +
    # one-hot temps plus double-buffered in/out tiles, all f32) stays well
    # inside the scoped-VMEM budget on every generation (v7x has only 64 MiB
    # of physical VMEM per TensorCore, so tiles are re-derived from K_pad/D).
    if block_rows is None:
        budget_bytes = 12 * 1024 * 1024
        per_row_bytes = 4 * (2 * K_pad + 4 * D)
        block_rows = max(128, min(2048,
                                  (budget_bytes // per_row_bytes) // 128 * 128))
    assert block_rows % 8 == 0, "block_rows must be a multiple of 8"
    TN = min(block_rows, _round_up(N, 8))
    N_pad = _round_up(N, TN)
    num_blocks = N_pad // TN
    if N_pad != N:
        flat = jnp.pad(flat, ((0, N_pad - N), (0, 0)))

    kernel = functools.partial(_vq_kernel, n_valid=N, needs_mask=(N_pad != N))

    q_flat, idx, loss_parts = pl.pallas_call(
        kernel,
        grid=(num_blocks,),
        in_specs=[
            pl.BlockSpec((TN, D), lambda i: (i, 0)),       # latent rows (tiled)
            pl.BlockSpec((D, K_pad), lambda i: (0, 0)),    # codebook^T (resident)
            pl.BlockSpec((K_pad, D), lambda i: (0, 0)),    # codebook   (resident)
            pl.BlockSpec((1, K_pad), lambda i: (0, 0)),    # ||e||^2    (resident)
        ],
        out_specs=(
            pl.BlockSpec((TN, D), lambda i: (i, 0)),       # quantized rows
            pl.BlockSpec((TN, 1), lambda i: (i, 0)),       # code indices
            pl.BlockSpec((8, 128), lambda i: (i, 0)),      # per-block SSE partials
        ),
        out_shape=(
            jax.ShapeDtypeStruct((N_pad, D), jnp.float32),
            jax.ShapeDtypeStruct((N_pad, 1), jnp.int32),
            jax.ShapeDtypeStruct((num_blocks * 8, 128), jnp.float32),
        ),
        compiler_params=pltpu.CompilerParams(
            dimension_semantics=("parallel",),
            vmem_limit_bytes=48 * 1024 * 1024,
        ),
    )(flat, e_t_pad, e_pad, e_sq_pad)

    # Straight-through estimator: the forward value equals the quantized rows.
    q_nhwc = q_flat[:N].reshape(B, H, W, D)
    q_nchw = jnp.transpose(q_nhwc, (0, 3, 1, 2))
    state = idx[:N, 0].reshape(B, H * W)
    sse = jnp.sum(loss_parts.reshape(num_blocks, 8, 128)[:, 0, 0])
    vq_loss = (1.0 + beta) * sse / jnp.float32(N * D)
    return q_nchw, vq_loss, state


def _reference_forward(latents_nchw, embedding, beta=0.25):
    B, D, H, W = latents_nchw.shape
    lat = jnp.transpose(latents_nchw, (0, 2, 3, 1)).reshape(-1, D)
    dist = (jnp.sum(lat ** 2, axis=1, keepdims=True)
            + jnp.sum(embedding ** 2, axis=1)
            - 2.0 * lat @ embedding.T)
    inds = jnp.argmin(dist, axis=1)
    q = embedding[inds]
    mse = jnp.mean((q - lat) ** 2)
    vq_loss = (1.0 + beta) * mse
    q_nchw = jnp.transpose(q.reshape(B, H, W, D), (0, 3, 1, 2))
    return q_nchw, vq_loss, inds.reshape(B, H * W)


if __name__ == "__main__":
    # Module hyperparameters (small, consistent with the nn.Module shapes).
    num_embeddings = 8   # K
    embedding_dim = 4    # D
    beta = 0.25

    key = jax.random.PRNGKey(0)
    k_lat, k_emb = jax.random.split(key)

    # Inputs: NCHW latents, channel dim == embedding_dim.
    latents = jax.random.normal(k_lat, (2, embedding_dim, 16, 16),
                                dtype=jnp.float32)

    # Deterministic codebook init: uniform(-1/K, 1/K), same as the module.
    embedding = jax.random.uniform(
        k_emb, (num_embeddings, embedding_dim),
        minval=-1.0 / num_embeddings, maxval=1.0 / num_embeddings,
        dtype=jnp.float32)

    # block_rows=256 -> a 2-step "parallel" grid over N = 2*16*16 = 512 rows,
    # exercising the pipelined (double-buffered) path even at this toy size.
    q, vq_loss, state = vector_quantizer_forward(latents, embedding,
                                                 beta=beta, block_rows=256)
    jax.block_until_ready((q, vq_loss, state))

    # Lightweight correctness check against a pure-JAX reference.
    q_ref, loss_ref, state_ref = _reference_forward(latents, embedding, beta=beta)
    assert q.shape == (2, embedding_dim, 16, 16)
    assert state.shape == (2, 16 * 16)
    assert jnp.allclose(q, q_ref, atol=1e-5)
    assert jnp.allclose(vq_loss, loss_ref, atol=1e-5)
    assert jnp.array_equal(state, state_ref.astype(jnp.int32))

    print("KERNEL_OK")
</pallas_src>

<mosaic_0001>
module attributes {stable_mosaic.version = 11 : i64} {
  func.func @_vq_kernel(%arg0: i32, %arg1: memref<256x4xf32, #tpu.memory_space<vmem>>, %arg2: memref<4x128xf32, #tpu.memory_space<vmem>>, %arg3: memref<128x4xf32, #tpu.memory_space<vmem>>, %arg4: memref<1x128xf32, #tpu.memory_space<vmem>>, %arg5: memref<256x4xf32, #tpu.memory_space<vmem>>, %arg6: memref<256x1xi32, #tpu.memory_space<vmem>>, %arg7: memref<8x128xf32, #tpu.memory_space<vmem>>) attributes {dimension_semantics = [#tpu.dimension_semantics<parallel>], iteration_bounds = array<i64: 2>, scalar_prefetch = 0 : i64, scratch_operands = 0 : i64, tpu.core_type = #tpu.core_type<tc>, window_params = [{transform_indices = @transform_0, window_bounds = array<i64: 256, 4>}, {pipeline_mode = #tpu.pipeline_mode<synchronous>, transform_indices = @transform_1, window_bounds = array<i64: 4, 128>}, {pipeline_mode = #tpu.pipeline_mode<synchronous>, transform_indices = @transform_2, window_bounds = array<i64: 128, 4>}, {pipeline_mode = #tpu.pipeline_mode<synchronous>, transform_indices = @transform_3, window_bounds = array<i64: 1, 128>}, {transform_indices = @transform_4, window_bounds = array<i64: 256, 4>}, {transform_indices = @transform_5, window_bounds = array<i64: 256, 1>}, {transform_indices = @transform_6, window_bounds = array<i64: 8, 128>}]} {
    %c0 = arith.constant 0 : index
    %c0_0 = arith.constant 0 : index
    %0 = vector.load %arg1[%c0, %c0_0] : memref<256x4xf32, #tpu.memory_space<vmem>>, vector<256x4xf32>
    %c0_1 = arith.constant 0 : index
    %c0_2 = arith.constant 0 : index
    %1 = vector.load %arg2[%c0_1, %c0_2] : memref<4x128xf32, #tpu.memory_space<vmem>>, vector<4x128xf32>
    %c0_3 = arith.constant 0 : index
    %c0_4 = arith.constant 0 : index
    %2 = vector.load %arg3[%c0_3, %c0_4] : memref<128x4xf32, #tpu.memory_space<vmem>>, vector<128x4xf32>
    %c0_5 = arith.constant 0 : index
    %c0_6 = arith.constant 0 : index
    %3 = vector.load %arg4[%c0_5, %c0_6] : memref<1x128xf32, #tpu.memory_space<vmem>>, vector<1x128xf32>
    %cst = arith.constant dense<0.000000e+00> : vector<256x128xf32>
    %4 = tpu.matmul %0, %1, %cst {dimension_numbers = #tpu.dot_dimension_numbers<[1], [0], [0], [1], [0, 0, 1, 1], [], []>} : vector<256x4xf32>, vector<4x128xf32>, vector<256x128xf32> -> vector<256x128xf32>
    %cst_7 = arith.constant 2.000000e+00 : f32
    %5 = vector.broadcast %cst_7 : f32 to vector<256x128xf32>
    %6 = arith.mulf %5, %4 : vector<256x128xf32>
    %7 = vector.broadcast %3 : vector<1x128xf32> to vector<256x128xf32>
    %8 = arith.subf %7, %6 : vector<256x128xf32>
    %9 = tpu.iota {dimensions = array<i32: 1>} : vector<256x128xi32>
    %cst_8 = arith.constant dense<0x7F800000> : vector<256xf32>
    %10 = vector.multi_reduction <minimumf>, %8, %cst_8 [1] : vector<256x128xf32> to vector<256xf32>
    %11 = vector.shape_cast %10 : vector<256xf32> to vector<256x1xf32>
    %12 = vector.broadcast %11 : vector<256x1xf32> to vector<256x128xf32>
    %13 = arith.cmpf oeq, %8, %12 : vector<256x128xf32>
    %c128_i32 = arith.constant 128 : i32
    %14 = vector.broadcast %c128_i32 : i32 to vector<256x128xi32>
    %15 = arith.select %13, %9, %14 : vector<256x128xi1>, vector<256x128xi32>
    %cst_9 = arith.constant dense<2147483647> : vector<256xi32>
    %16 = vector.multi_reduction <minsi>, %15, %cst_9 [1] : vector<256x128xi32> to vector<256xi32>
    %17 = vector.shape_cast %16 : vector<256xi32> to vector<256x1xi32>
    %18 = vector.broadcast %17 : vector<256x1xi32> to vector<256x128xi32>
    %19 = arith.cmpi eq, %15, %18 : vector<256x128xi32>
    %20 = arith.extui %19 : vector<256x128xi1> to vector<256x128xi32>
    %21 = arith.sitofp %20 : vector<256x128xi32> to vector<256x128xf32>
    %cst_10 = arith.constant dense<0.000000e+00> : vector<256x4xf32>
    %22 = tpu.matmul %21, %2, %cst_10 {dimension_numbers = #tpu.dot_dimension_numbers<[1], [0], [0], [1], [0, 0, 1, 1], [], []>} : vector<256x128xf32>, vector<128x4xf32>, vector<256x4xf32> -> vector<256x4xf32>
    %23 = arith.subf %22, %0 : vector<256x4xf32>
    %24 = arith.mulf %23, %23 : vector<256x4xf32>
    %25 = vector.shape_cast %24 : vector<256x4xf32> to vector<1x256x4xf32>
    %cst_11 = arith.constant dense<0.000000e+00> : vector<1xf32>
    %26 = vector.multi_reduction <add>, %25, %cst_11 [1, 2] : vector<1x256x4xf32> to vector<1xf32>
    %27 = vector.shape_cast %26 : vector<1xf32> to vector<1x1x1xf32>
    %28 = vector.extract %27[0, 0, 0] : f32 from vector<1x1x1xf32>
    %c0_12 = arith.constant 0 : index
    %c0_13 = arith.constant 0 : index
    %29 = vector.load %arg5[%c0_12, %c0_13] : memref<256x4xf32, #tpu.memory_space<vmem>>, vector<256x4xf32>
    tpu.vector_store %arg5[%c0_12, %c0_13], %22 {strides = array<i32>} : memref<256x4xf32, #tpu.memory_space<vmem>>, vector<256x4xf32>,
    %c0_14 = arith.constant 0 : index
    %c0_15 = arith.constant 0 : index
    %30 = vector.load %arg6[%c0_14, %c0_15] : memref<256x1xi32, #tpu.memory_space<vmem>>, vector<256x1xi32>
    tpu.vector_store %arg6[%c0_14, %c0_15], %17 {strides = array<i32>} : memref<256x1xi32, #tpu.memory_space<vmem>>, vector<256x1xi32>,
    %31 = vector.broadcast %28 : f32 to vector<8x128xf32>
    %c0_16 = arith.constant 0 : index
    %c0_17 = arith.constant 0 : index
    %32 = vector.load %arg7[%c0_16, %c0_17] : memref<8x128xf32, #tpu.memory_space<vmem>>, vector<8x128xf32>
    tpu.vector_store %arg7[%c0_16, %c0_17], %31 {strides = array<i32>} : memref<8x128xf32, #tpu.memory_space<vmem>>, vector<8x128xf32>,
    return
  }
  func.func @transform_0(%arg0: i32) -> (i32, i32) {
    %c0_i32 = arith.constant 0 : i32
    %c0_i32_0 = arith.constant 0 : i32
    return %arg0, %c0_i32 : i32, i32
  }
  func.func @transform_1(%arg0: i32) -> (i32, i32) {
    %c0_i32 = arith.constant 0 : i32
    %c0_i32_0 = arith.constant 0 : i32
    %c0_i32_1 = arith.constant 0 : i32
    return %c0_i32, %c0_i32_0 : i32, i32
  }
  func.func @transform_2(%arg0: i32) -> (i32, i32) {
    %c0_i32 = arith.constant 0 : i32
    %c0_i32_0 = arith.constant 0 : i32
    %c0_i32_1 = arith.constant 0 : i32
    return %c0_i32, %c0_i32_0 : i32, i32
  }
  func.func @transform_3(%arg0: i32) -> (i32, i32) {
    %c0_i32 = arith.constant 0 : i32
    %c0_i32_0 = arith.constant 0 : i32
    %c0_i32_1 = arith.constant 0 : i32
    return %c0_i32, %c0_i32_0 : i32, i32
  }
  func.func @transform_4(%arg0: i32) -> (i32, i32) {
    %c0_i32 = arith.constant 0 : i32
    %c0_i32_0 = arith.constant 0 : i32
    return %arg0, %c0_i32 : i32, i32
  }
  func.func @transform_5(%arg0: i32) -> (i32, i32) {
    %c0_i32 = arith.constant 0 : i32
    %c0_i32_0 = arith.constant 0 : i32
    return %arg0, %c0_i32 : i32, i32
  }
  func.func @transform_6(%arg0: i32) -> (i32, i32) {
    %c0_i32 = arith.constant 0 : i32
    %c0_i32_0 = arith.constant 0 : i32
    return %arg0, %c0_i32 : i32, i32
  }
}

</mosaic_0001>

<bundles_post_ra>
// kernel: tpu_custom_call.1
= control target key start
LH: loop header
LB: loop body
LE: loop exit
PB: predicated region body
PF: predicated region fallthrough
CT: control target
= control target key end

     0   :  { %12 = vsyncpa [#allocation3], 0  ;;  %s3585_s0 = inlined_call_operand.vmem [shape: f32[512,4], index: 0, kind: input, shape index: {}]   ;;  %s3586_s1 = inlined_call_operand.vmem [shape: f32[4,128], index: 1, kind: input, shape index: {}]   ;;  %s3587_s2 = inlined_call_operand.vmem [shape: f32[128,4], index: 2, kind: input, shape index: {}]   ;;  %s3588_s3 = inlined_call_operand.vmem [shape: f32[1,128], index: 3, kind: input, shape index: {}]   ;;  %s3589_s4 = inlined_call_operand.vmem [shape: f32[512,4], index: 4, kind: output, shape index: {0}]   ;;  %s3590_s5 = inlined_call_operand.vmem [shape: s32[512,1], index: 5, kind: output, shape index: {1}]   ;;  %s3591_s6 = inlined_call_operand.hbm [shape: f32[16,128], index: 6, kind: output, shape index: {2}]  }
   0x1   :  { %14 = vsyncpa [#allocation3 + $0x1], 0  ;;  %s2515_s21 = smov 0   ;;  %s2517_s22 = smov 0  }
   0x2   :  { %s2519_s23 = smov 0   ;;  %s2521_s24 = smov 0  }
   0x3 LB: > { %s2536_s25 = sadd.s32 4294967295, %s2476_s24   ;;  %s1968_s26 = sadd.s32 4294967294, %s2476_s24   ;;  %s2476_s24 = sphi %s2521_s24, %s3671_s24   ;;  %s2472_s23 = sphi %s2519_s23, %s3670_s23   ;;  %s2468_s22 = sphi %s2517_s22, %s3669_s22   ;;  %s2464_s21 = sphi %s2515_s21, %s3668_s21  }
   0x4   : > { %s2540_s27 = sadd.s32 1, %s2476_s24   ;;  %s168_s28 = sadd.s32 1, %s2472_s23 }
   0x5   : > { %s165_s29 = ssub.s32 %s2476_s24, %s2540_s27  ;;  %p178_p0 = scmp.ne.s32.totalorder %s2472_s23, %s2468_s22 }
   0x6   : > { %p166_p1 = scmp.eq.s32.totalorder %s165_s29, 0  ;;  %p179_p2 = scmp.eq.s32.totalorder %s2536_s25, 1 }
   0x7   : > { %p184_p3 = scmp.ne.s32.totalorder %s2468_s22, %s2464_s21  ;;  %p185_p4 = scmp.eq.s32.totalorder %s1968_s26, 1 }
   0x8   : > { %s2551_s30 = scalar_select %p166_p1, %s2472_s23, %s168_s28  }
   0x9   : > { %p2553_p5 = por %p179_p2, %p178_p0  ;;  %p2557_p6 = por %p185_p4, %p184_p3 }
   0xa   : > { %p1971_p7 = scmp.ge.s32.totalorder %s2476_s24, 1  ;;  %p221_p8 = scmp.lt.s32.totalorder %s2476_s24, 3 }
   0xc   : > { %p222_p9 = pnand %p1971_p7, %p221_p8 }
   0xe   : > { %225 = sbr.rel (%p222_p9) target bundleno = 1190 (0x4a6), region = 36 }
  0x15   : > { %v311_v0 = vld [vmem:[%s3586_s1] sm:$0xf]  ;;  %vm426_vm0 = vcmask 1043456   ;;  %s1973_s11 = sshll.u32 %s2536_s25, 5  ;;  %vm329_vm1 = vcmask 31744   ;;  %s2078_s19 = sshll.u32 %s2536_s25, 7 }
  0x16   : > { %2162 = vmatprep.subr.msk.mxu0 %vm426_vm0, %v311_v0  ;;  %p262_p10 = scmp.lt.s32.totalorder %s1973_s11, 63  ;;  %v2642_v35 = vld [vmem:[%s3588_s3] ss:$0 sm:$0xff]  ;;  %s3545_s29 = scalar_lea.hbm %s3591_s6, %s2078_s19 }
  0x17   : > { %2163 = vmatpush3.msk.msra.mxu0 %vm426_vm0, %v311_v0  ;;  %s2479_s25 = smov [#allocation2]  }
  0x18   : > { %s3673_s11 = smov (!%p262_p10, %s1973_s11), 63 }
  0x19   : > { %s2567_s12 = sshll.u32 %s3673_s11, 3 }
  0x1a   : > { %s2573_s15 = scalar_lea.vmem %s3585_s0, %s2567_s12  ;;  %s3245_s11 = scalar_lea.vmem %s3590_s5, %s2567_s12 }
  0x1b   : > { %v279_v1 = vld [vmem:[%s2573_s15] sm:$0xff]  ;;  %v280_v2 = vld [vmem:[%s2573_s15 + $0x8] sm:$0xff]  ;;  %v281_v3 = vld [vmem:[%s2573_s15 + $0x10] sm:$0xff]  ;;  %s3408_s16 = scalar_lea.vmem %s3589_s4, %s2567_s12  ;;  %s258_s12 = sand.u32 1, %s2468_s22  }
  0x1c   : > { %2164 = vmatprep.mubr.msk.f32.mxu0 %vm329_vm1, %v279_v1  ;;  %v282_v4 = vld [vmem:[%s2573_s15 + $0x18] sm:$0xff]  ;;  %v283_v5 = vld [vmem:[%s2573_s15 + $0x20] sm:$0xff]  ;;  %v284_v6 = vld [vmem:[%s2573_s15 + $0x28] sm:$0xff]  ;;  %s1838_s9 = scalar_lea.sflag [#allocation3], %s258_s12 }
  0x1d   : > { %2165 = vmatmul.mubr.msk.f32.vlgmr.msra.gmra.mrb[0].mxu0 %vm329_vm1, %v280_v2  ;;  %v285_v7 = vld [vmem:[%s2573_s15 + $0x30] sm:$0xff]  ;;  %v286_v8 = vld [vmem:[%s2573_s15 + $0x38] sm:$0xff]  ;;  %v287_v9 = vld [vmem:[%s2573_s15 + $0x40] sm:$0xff] }
  0x1e   : > { %2167 = vmatprep.mubr.msk.f32.mxu0 %vm329_vm1, %v281_v3  ;;  %v288_v10 = vld [vmem:[%s2573_s15 + $0x48] sm:$0xff]  ;;  %v289_v11 = vld [vmem:[%s2573_s15 + $0x50] sm:$0xff]  ;;  %v290_v12 = vld [vmem:[%s2573_s15 + $0x58] sm:$0xff] }
  0x1f   : > { %v291_v13 = vld [vmem:[%s2573_s15 + $0x60] sm:$0xff]  ;;  %v292_v14 = vld [vmem:[%s2573_s15 + $0x68] sm:$0xff]  ;;  %v293_v15 = vld [vmem:[%s2573_s15 + $0x70] sm:$0xff] }
  0x20   : > { %v294_v16 = vld [vmem:[%s2573_s15 + $0x78] sm:$0xff]  ;;  %v295_v17 = vld [vmem:[%s2573_s15 + $0x80] sm:$0xff]  ;;  %v296_v18 = vld [vmem:[%s2573_s15 + $0x88] sm:$0xff] }
  0x21   : > { %2168 = vmatmul.mubr.msk.f32.gmra.mrb[2].mxu0 %vm329_vm1, %v282_v4  ;;  %v297_v19 = vld [vmem:[%s2573_s15 + $0x90] sm:$0xff]  ;;  %v298_v20 = vld [vmem:[%s2573_s15 + $0x98] sm:$0xff]  ;;  %v299_v21 = vld [vmem:[%s2573_s15 + $0xa0] sm:$0xff] }
  0x22   : > { %2170 = vmatprep.mubr.msk.f32.mxu0 %vm329_vm1, %v283_v5  ;;  %v300_v22 = vld [vmem:[%s2573_s15 + $0xa8] sm:$0xff]  ;;  %v301_v23 = vld [vmem:[%s2573_s15 + $0xb0] sm:$0xff]  ;;  %v302_v24 = vld [vmem:[%s2573_s15 + $0xb8] sm:$0xff] }
  0x23   : > { %v303_v25 = vld [vmem:[%s2573_s15 + $0xc0] sm:$0xff]  ;;  %v304_v26 = vld [vmem:[%s2573_s15 + $0xc8] sm:$0xff]  ;;  %v305_v27 = vld [vmem:[%s2573_s15 + $0xd0] sm:$0xff] }
  0x24   : > { %v306_v28 = vld [vmem:[%s2573_s15 + $0xd8] sm:$0xff]  ;;  %v307_v29 = vld [vmem:[%s2573_s15 + $0xe0] sm:$0xff]  ;;  %v308_v30 = vld [vmem:[%s2573_s15 + $0xe8] sm:$0xff] }
  0x25   : > { %2171 = vmatmul.mubr.msk.f32.gmra.mrb[4].mxu0 %vm329_vm1, %v284_v6  ;;  %v309_v31 = vld [vmem:[%s2573_s15 + $0xf0] sm:$0xff]  ;;  %v310_v32 = vld [vmem:[%s2573_s15 + $0xf8] sm:$0xff] }
  0x26   : > { %2173 = vmatprep.mubr.msk.f32.mxu0 %vm329_vm1, %v285_v7 }
  0x29   : > { %2174 = vmatmul.mubr.msk.f32.gmra.mrb[6].mxu0 %vm329_vm1, %v286_v8 }
  0x2a   : > { %2176 = vmatprep.mubr.msk.f32.mxu0 %vm329_vm1, %v287_v9 }
  0x2d   : > { %2177 = vmatmul.mubr.msk.f32.gmra.mrb[8].mxu0 %vm329_vm1, %v288_v10 }
  0x2e   : > { %2179 = vmatprep.mubr.msk.f32.mxu0 %vm329_vm1, %v289_v11 }
  0x31   : > { %2180 = vmatmul.mubr.msk.f32.gmra.mrb[10].mxu0 %vm329_vm1, %v290_v12 }
  0x32   : > { %2182 = vmatprep.mubr.msk.f32.mxu0 %vm329_vm1, %v291_v13 }
  0x35   : > { %2183 = vmatmul.mubr.msk.f32.gmra.mrb[12].mxu0 %vm329_vm1, %v292_v14 }
  0x36   : > { %2185 = vmatprep.mubr.msk.f32.mxu0 %vm329_vm1, %v293_v15 }
  0x39   : > { %2186 = vmatmul.mubr.msk.f32.gmra.mrb[14].mxu0 %vm329_vm1, %v294_v16 }
  0x3a   : > { %2188 = vmatprep.mubr.msk.f32.mxu0 %vm329_vm1, %v295_v17 }
  0x3d   : > { %2189 = vmatmul.mubr.msk.f32.gmra.mrb[16].mxu0 %vm329_vm1, %v296_v18 }
  0x3e   : > { %2191 = vmatprep.mubr.msk.f32.mxu0 %vm329_vm1, %v297_v19 }
  0x41   : > { %2192 = vmatmul.mubr.msk.f32.gmra.mrb[18].mxu0 %vm329_vm1, %v298_v20 }
  0x42   : > { %2194 = vmatprep.mubr.msk.f32.mxu0 %vm329_vm1, %v299_v21 }
  0x45   : > { %2195 = vmatmul.mubr.msk.f32.gmra.mrb[20].mxu0 %vm329_vm1, %v300_v22 }
  0x46   : > { %2197 = vmatprep.mubr.msk.f32.mxu0 %vm329_vm1, %v301_v23 }
  0x49   : > { %2198 = vmatmul.mubr.msk.f32.gmra.mrb[22].mxu0 %vm329_vm1, %v302_v24 }
  0x4a   : > { %2200 = vmatprep.mubr.msk.f32.mxu0 %vm329_vm1, %v303_v25 }
  0x4d   : > { %2201 = vmatmul.mubr.msk.f32.gmra.mrb[24].mxu0 %vm329_vm1, %v304_v26 }
  0x4e   : > { %2203 = vmatprep.mubr.msk.f32.mxu0 %vm329_vm1, %v305_v27 }
  0x51   : > { %2204 = vmatmul.mubr.msk.f32.gmra.mrb[26].mxu0 %vm329_vm1, %v306_v28 }
  0x52   : > { %2206 = vmatprep.mubr.msk.f32.mxu0 %vm329_vm1, %v307_v29 }
  0x55   : > { %2207 = vmatmul.mubr.msk.f32.gmra.mrb[28].mxu0 %vm329_vm1, %v308_v30 }
  0x56   : > { %2209 = vmatprep.mubr.msk.f32.mxu0 %vm329_vm1, %v309_v31 }
  0x59   : > { %2210 = vmatmul.mubr.msk.f32.gmra.mrb[30].mxu0 %vm329_vm1, %v310_v32 }
  0xf0   : > { %v2166_v33 = vpop.f32.mrb[0].mxu0 }
  0xf1   : > { %v496_v34 = vpop.f32.mrb[1].mxu0  ;;  %v656_v37 = vmul.f32 2.0, %v2166_v33 }
  0xf2   : > { %v655_v36 = vmul.f32 2.0, %v496_v34 }
  0xf3   : > { %v2649_v44 = vsub.f32 %v2642_v35, %v656_v37 }
  0xf4   : > { %v2169_v38 = vpop.f32.mrb[2].mxu0  ;;  %v2645_v39 = vsub.f32 %v2642_v35, %v655_v36 }
  0xf5   : > { %v506_v40 = vpop.f32.mrb[3].mxu0  ;;  %v658_v42 = vmul.f32 2.0, %v2169_v38 }
  0xf6   : > { %v657_v41 = vmul.f32 2.0, %v506_v40  ;;  %727 = vmin.xlane.f32.xlu0 %v2645_v39 }
  0xf7   : > { %v2657_v50 = vsub.f32 %v2642_v35, %v658_v42 }
  0xf8   : > { %v2172_v43 = vpop.f32.mrb[4].mxu0  ;;  %v2652_v45 = vsub.f32 %v2642_v35, %v657_v41 }
  0xf9   : > { %v516_v46 = vpop.f32.mrb[5].mxu0  ;;  %v660_v48 = vmul.f32 2.0, %v2172_v43 }
  0xfa   : > { %v659_v47 = vmul.f32 2.0, %v516_v46  ;;  %729 = vmin.xlane.f32.xlu0 %v2649_v44  ;;  %731 = vmin.xlane.f32.xlu1 %v2652_v45 }
  0xfb   : > { %v2665_v56 = vsub.f32 %v2642_v35, %v660_v48 }
  0xfc   : > { %v2175_v49 = vpop.f32.mrb[6].mxu0  ;;  %v2660_v51 = vsub.f32 %v2642_v35, %v659_v47 }
  0xfd   : > { %v526_v52 = vpop.f32.mrb[7].mxu0  ;;  %v662_v54 = vmul.f32 2.0, %v2175_v49 }
  0xfe   : > { %v661_v53 = vmul.f32 2.0, %v526_v52  ;;  %733 = vmin.xlane.f32.xlu1 %v2657_v50  ;;  %735 = vmin.xlane.f32.xlu0 %v2660_v51 }
  0xff   : > { %v2673_v62 = vsub.f32 %v2642_v35, %v662_v54 }
 0x100   : > { %v2178_v55 = vpop.f32.mrb[8].mxu0  ;;  %v2668_v57 = vsub.f32 %v2642_v35, %v661_v53 }
 0x101   : > { %v536_v58 = vpop.f32.mrb[9].mxu0  ;;  %v664_v60 = vmul.f32 2.0, %v2178_v55 }
 0x102   : > { %v663_v59 = vmul.f32 2.0, %v536_v58  ;;  %737 = vmin.xlane.f32.xlu1 %v2665_v56  ;;  %739 = vmin.xlane.f32.xlu0 %v2668_v57 }
 0x103   : > { %v2681_v4 = vsub.f32 %v2642_v35, %v664_v60 }
 0x104   : > { %v2181_v61 = vpop.f32.mrb[10].mxu0  ;;  %v2676_v63 = vsub.f32 %v2642_v35, %v663_v59 }
 0x105   : > { %v546_v0 = vpop.f32.mrb[11].mxu0  ;;  %v666_v2 = vmul.f32 2.0, %v2181_v61 }
 0x106   : > { %v665_v1 = vmul.f32 2.0, %v546_v0  ;;  %741 = vmin.xlane.f32.xlu1 %v2673_v62  ;;  %743 = vmin.xlane.f32.xlu0 %v2676_v63 }
 0x107   : > { %v2689_v10 = vsub.f32 %v2642_v35, %v666_v2 }
 0x108   : > { %v2184_v3 = vpop.f32.mrb[12].mxu0  ;;  %v2684_v5 = vsub.f32 %v2642_v35, %v665_v1 }
 0x109   : > { %v556_v6 = vpop.f32.mrb[13].mxu0  ;;  %v668_v8 = vmul.f32 2.0, %v2184_v3 }
 0x10a   : > { %v667_v7 = vmul.f32 2.0, %v556_v6  ;;  %745 = vmin.xlane.f32.xlu1 %v2681_v4  ;;  %747 = vmin.xlane.f32.xlu0 %v2684_v5 }
 0x10b   : > { %v2697_v16 = vsub.f32 %v2642_v35, %v668_v8 }
 0x10c   : > { %v2187_v9 = vpop.f32.mrb[14].mxu0  ;;  %v2692_v11 = vsub.f32 %v2642_v35, %v667_v7 }
 0x10d   : > { %v566_v12 = vpop.f32.mrb[15].mxu0  ;;  %v670_v14 = vmul.f32 2.0, %v2187_v9 }
 0x10e   : > { %v669_v13 = vmul.f32 2.0, %v566_v12  ;;  %749 = vmin.xlane.f32.xlu1 %v2689_v10  ;;  %751 = vmin.xlane.f32.xlu0 %v2692_v11 }
 0x10f   : > { %v2705_v22 = vsub.f32 %v2642_v35, %v670_v14 }
 0x110   : > { %v2190_v15 = vpop.f32.mrb[16].mxu0  ;;  %v2700_v17 = vsub.f32 %v2642_v35, %v669_v13 }
 0x111   : > { %v576_v18 = vpop.f32.mrb[17].mxu0  ;;  %v672_v20 = vmul.f32 2.0, %v2190_v15 }
 0x112   : > { %v671_v19 = vmul.f32 2.0, %v576_v18  ;;  %753 = vmin.xlane.f32.xlu1 %v2697_v16  ;;  %755 = vmin.xlane.f32.xlu0 %v2700_v17  ;;  %v725_v18 = vlaneseq }
 0x113   : > { %v2713_v28 = vsub.f32 %v2642_v35, %v672_v20 }
 0x114   : > { %v2193_v21 = vpop.f32.mrb[18].mxu0  ;;  %v2708_v23 = vsub.f32 %v2642_v35, %v671_v19  ;;  %v2772_v19 = vand.u32 127, %v725_v18 }
 0x115   : > { %v586_v24 = vpop.f32.mrb[19].mxu0  ;;  %v674_v26 = vmul.f32 2.0, %v2193_v21 }
 0x116   : > { %v673_v25 = vmul.f32 2.0, %v586_v24  ;;  %757 = vmin.xlane.f32.xlu1 %v2705_v22  ;;  %759 = vmin.xlane.f32.xlu0 %v2708_v23 }
 0x117   : > { %v2721_v34 = vsub.f32 %v2642_v35, %v674_v26 }
 0x118   : > { %v2196_v27 = vpop.f32.mrb[20].mxu0  ;;  %v2716_v29 = vsub.f32 %v2642_v35, %v673_v25 }
 0x119   : > { %v596_v30 = vpop.f32.mrb[21].mxu0  ;;  %v676_v32 = vmul.f32 2.0, %v2196_v27 }
 0x11a   : > { %v675_v31 = vmul.f32 2.0, %v596_v30  ;;  %761 = vmin.xlane.f32.xlu1 %v2713_v28  ;;  %763 = vmin.xlane.f32.xlu0 %v2716_v29 }
 0x11b   : > { %v2729_v42 = vsub.f32 %v2642_v35, %v676_v32 }
 0x11c   : > { %v2199_v33 = vpop.f32.mrb[22].mxu0  ;;  %v2724_v36 = vsub.f32 %v2642_v35, %v675_v31 }
 0x11d   : > { %v606_v37 = vpop.f32.mrb[23].mxu0  ;;  %v678_v40 = vmul.f32 2.0, %v2199_v33 }
 0x11e   : > { %v677_v38 = vmul.f32 2.0, %v606_v37  ;;  %765 = vmin.xlane.f32.xlu1 %v2721_v34  ;;  %767 = vmin.xlane.f32.xlu0 %v2724_v36 }
 0x11f   : > { %v2737_v52 = vsub.f32 %v2642_v35, %v678_v40 }
 0x120   : > { %v2202_v41 = vpop.f32.mrb[24].mxu0  ;;  %v2732_v43 = vsub.f32 %v2642_v35, %v677_v38 }
 0x121   : > { %v616_v46 = vpop.f32.mrb[25].mxu0  ;;  %v680_v48 = vmul.f32 2.0, %v2202_v41 }
 0x122   : > { %v679_v47 = vmul.f32 2.0, %v616_v46  ;;  %769 = vmin.xlane.f32.xlu1 %v2729_v42  ;;  %771 = vmin.xlane.f32.xlu0 %v2732_v43 }
 0x123   : > { %v2745_v60 = vsub.f32 %v2642_v35, %v680_v48 }
 0x124   : > { %v2205_v49 = vpop.f32.mrb[26].mxu0  ;;  %v2740_v53 = vsub.f32 %v2642_v35, %v679_v47 }
 0x125   : > { %v626_v54 = vpop.f32.mrb[27].mxu0  ;;  %v682_v58 = vmul.f32 2.0, %v2205_v49 }
 0x126   : > { %v681_v55 = vmul.f32 2.0, %v626_v54  ;;  %773 = vmin.xlane.f32.xlu1 %v2737_v52  ;;  %775 = vmin.xlane.f32.xlu0 %v2740_v53 }
 0x127   : > { %v2753_v6 = vsub.f32 %v2642_v35, %v682_v58 }
 0x128   : > { %v2208_v59 = vpop.f32.mrb[28].mxu0  ;;  %v2748_v61 = vsub.f32 %v2642_v35, %v681_v55 }
 0x129   : > { %v636_v0 = vpop.f32.mrb[29].mxu0  ;;  %v684_v2 = vmul.f32 2.0, %v2208_v59 }
 0x12a   : > { %v683_v1 = vmul.f32 2.0, %v636_v0  ;;  %777 = vmin.xlane.f32.xlu1 %v2745_v60  ;;  %779 = vmin.xlane.f32.xlu0 %v2748_v61 }
 0x12b   : > { %v2764_v14 = vsub.f32 %v2642_v35, %v684_v2 }
 0x12c   : > { %v2211_v3 = vpop.f32.mrb[30].mxu0  ;;  %v2756_v7 = vsub.f32 %v2642_v35, %v683_v1 }
 0x12d   : > { %v686_v8 = vmul.f32 2.0, %v2211_v3  ;;  %v646_v9 = vpop.f32.mrb[31].mxu0 }
 0x12e   : > { %v685_v12 = vmul.f32 2.0, %v646_v9  ;;  %781 = vmin.xlane.f32.xlu1 %v2753_v6  ;;  %783 = vmin.xlane.f32.xlu0 %v2756_v7 }
 0x12f   : > { %v2761_v13 = vsub.f32 %v2642_v35, %v686_v8 }
 0x130   : > { %v2767_v15 = vsub.f32 %v2642_v35, %v685_v12 }
 0x132   : > { %785 = vmin.xlane.f32.xlu1 %v2764_v14  ;;  %787 = vmin.xlane.f32.xlu0 %v2767_v15 }
 0x136   : > { %789 = vmin.xlane.f32.xlu1 %v2761_v13 }
 0x183   : > { %v728_v20 = vpop.xlane.xlu0 %727 }
 0x184   : > { %vm791_vm2 = vcmp.eq.f32.partialorder %v2645_v39, %v728_v20 }
 0x185   : > { %v2776_v21 = vsel %vm791_vm2, %v2772_v19, 128 }
 0x186   : > { %3619 = vst [vmem:[#allocation5_spill] sm:$0xff] %v2776_v21  ;;  %v856_v24 = vshra.s32 %v2776_v21, 16 }
 0x187   : > { %v730_v25 = vpop.xlane.xlu0 %729  ;;  %v732_v35 = vpop.xlane.xlu1 %731 }
 0x188   : > { %vm792_vm3 = vcmp.eq.f32.partialorder %v2649_v44, %v730_v25  ;;  %vm793_vm4 = vcmp.eq.f32.partialorder %v2652_v45, %v732_v35  ;;  %v2781_v26 = vcvt.s32.f32 %v856_v24 }
 0x189   : > { %v2784_v27 = vsel %vm792_vm3, %v2772_v19, 128  ;;  %v2787_v30 = vsel %vm793_vm4, %v2772_v19, 128 }
 0x18a   : > { %859 = vmin.xlane.f32.xlu0 %v2781_v26  ;;  %v870_v39 = vshra.s32 %v2784_v27, 16  ;;  %v884_v31 = vshra.s32 %v2787_v30, 16 }
 0x18b   : > { %v734_v32 = vpop.xlane.xlu1 %733  ;;  %v736_v33 = vpop.xlane.xlu0 %735 }
 0x18c   : > { %vm794_vm5 = vcmp.eq.f32.partialorder %v2657_v50, %v734_v32  ;;  %vm795_vm6 = vcmp.eq.f32.partialorder %v2660_v51, %v736_v33  ;;  %v2794_v44 = vcvt.s32.f32 %v870_v39  ;;  %v2796_v45 = vcvt.s32.f32 %v884_v31 }
 0x18d   : > { %v2799_v37 = vsel %vm794_vm5, %v2772_v19, 128  ;;  %v2802_v38 = vsel %vm795_vm6, %v2772_v19, 128 }
 0x18e   : > { %3620 = vst [vmem:[#allocation6_spill] sm:$0xff] %v2799_v37  ;;  %3621 = vst [vmem:[#allocation7_spill] sm:$0xff] %v2802_v38  ;;  %873 = vmin.xlane.f32.xlu1 %v2794_v44  ;;  %887 = vmin.xlane.f32.xlu0 %v2796_v45  ;;  %v898_v40 = vshra.s32 %v2799_v37, 16  ;;  %v912_v50 = vshra.s32 %v2802_v38, 16 }
 0x18f   : > { %v738_v41 = vpop.xlane.xlu1 %737  ;;  %v740_v51 = vpop.xlane.xlu0 %739 }
 0x190   : > { %vm796_vm7 = vcmp.eq.f32.partialorder %v2665_v56, %v738_v41  ;;  %vm797_vm8 = vcmp.eq.f32.partialorder %v2668_v57, %v740_v51  ;;  %v2810_v46 = vcvt.s32.f32 %v898_v40  ;;  %v2812_v47 = vcvt.s32.f32 %v912_v50 }
 0x191   : > { %v2815_v48 = vsel %vm796_vm7, %v2772_v19, 128  ;;  %v2818_v49 = vsel %vm797_vm8, %v2772_v19, 128 }
 0x192   : > { %901 = vmin.xlane.f32.xlu1 %v2810_v46  ;;  %915 = vmin.xlane.f32.xlu0 %v2812_v47  ;;  %v926_v54 = vshra.s32 %v2815_v48, 16  ;;  %v940_v56 = vshra.s32 %v2818_v49, 16 }
 0x193   : > { %v742_v55 = vpop.xlane.xlu1 %741  ;;  %v744_v57 = vpop.xlane.xlu0 %743 }
 0x194   : > { %vm798_vm9 = vcmp.eq.f32.partialorder %v2673_v62, %v742_v55  ;;  %vm799_vm10 = vcmp.eq.f32.partialorder %v2676_v63, %v744_v57  ;;  %v2826_v58 = vcvt.s32.f32 %v926_v54  ;;  %v2828_v59 = vcvt.s32.f32 %v940_v56 }
 0x195   : > { %v2831_v0 = vsel %vm798_vm9, %v2772_v19, 128  ;;  %v2834_v1 = vsel %vm799_vm10, %v2772_v19, 128 }
 0x196   : > { %929 = vmin.xlane.f32.xlu1 %v2826_v58  ;;  %943 = vmin.xlane.f32.xlu0 %v2828_v59  ;;  %v954_v2 = vshra.s32 %v2831_v0, 16  ;;  %v968_v62 = vshra.s32 %v2834_v1, 16 }
 0x197   : > { %v746_v3 = vpop.xlane.xlu1 %745  ;;  %v748_v63 = vpop.xlane.xlu0 %747 }
 0x198   : > { %vm800_vm11 = vcmp.eq.f32.partialorder %v2681_v4, %v746_v3  ;;  %vm801_vm12 = vcmp.eq.f32.partialorder %v2684_v5, %v748_v63  ;;  %v2842_v8 = vcvt.s32.f32 %v954_v2  ;;  %v2844_v9 = vcvt.s32.f32 %v968_v62 }
 0x199   : > { %v2847_v12 = vsel %vm800_vm11, %v2772_v19, 128  ;;  %v2850_v18 = vsel %vm801_vm12, %v2772_v19, 128 }
 0x19a   : > { %3622 = vst [vmem:[#allocation8_spill] sm:$0xff] %v2850_v18  ;;  %957 = vmin.xlane.f32.xlu1 %v2842_v8  ;;  %971 = vmin.xlane.f32.xlu0 %v2844_v9  ;;  %v982_v20 = vshra.s32 %v2847_v12, 16  ;;  %v996_v4 = vshra.s32 %v2850_v18, 16 }
 0x19b   : > { %v750_v24 = vpop.xlane.xlu1 %749  ;;  %v752_v5 = vpop.xlane.xlu0 %751 }
 0x19c   : > { %vm802_vm13 = vcmp.eq.f32.partialorder %v2689_v10, %v750_v24  ;;  %vm803_vm14 = vcmp.eq.f32.partialorder %v2692_v11, %v752_v5  ;;  %v2858_v25 = vcvt.s32.f32 %v982_v20  ;;  %v2860_v35 = vcvt.s32.f32 %v996_v4 }
 0x19d   : > { %v2863_v39 = vsel %vm802_vm13, %v2772_v19, 128  ;;  %v2866_v31 = vsel %vm803_vm14, %v2772_v19, 128 }
 0x19e   : > { %3623 = vst [vmem:[#allocation9_spill] sm:$0xff] %v2863_v39  ;;  %3624 = vst [vmem:[#allocation10_spill] sm:$0xff] %v2866_v31  ;;  %985 = vmin.xlane.f32.xlu1 %v2858_v25  ;;  %999 = vmin.xlane.f32.xlu0 %v2860_v35  ;;  %v1010_v32 = vshra.s32 %v2863_v39, 16  ;;  %v1024_v10 = vshra.s32 %v2866_v31, 16 }
 0x19f   : > { %v754_v33 = vpop.xlane.xlu1 %753  ;;  %v756_v11 = vpop.xlane.xlu0 %755 }
 0x1a0   : > { %vm804_vm15 = vcmp.eq.f32.partialorder %v2697_v16, %v754_v33  ;;  %vm805_vm0 = vcmp.eq.f32.partialorder %v2700_v17, %v756_v11  ;;  %v2874_v40 = vcvt.s32.f32 %v1010_v32  ;;  %v2876_v50 = vcvt.s32.f32 %v1024_v10 }
 0x1a1   : > { %v2879_v41 = vsel %vm804_vm15, %v2772_v19, 128  ;;  %v2882_v51 = vsel %vm805_vm0, %v2772_v19, 128 }
 0x1a2   : > { %1013 = vmin.xlane.f32.xlu1 %v2874_v40  ;;  %1027 = vmin.xlane.f32.xlu0 %v2876_v50  ;;  %v1038_v54 = vshra.s32 %v2879_v41, 16  ;;  %v1052_v16 = vshra.s32 %v2882_v51, 16 }
 0x1a3   : > { %v758_v56 = vpop.xlane.xlu1 %757  ;;  %v760_v17 = vpop.xlane.xlu0 %759 }
 0x1a4   : > { %vm806_vm2 = vcmp.eq.f32.partialorder %v2705_v22, %v758_v56  ;;  %vm807_vm3 = vcmp.eq.f32.partialorder %v2708_v23, %v760_v17  ;;  %v2890_v55 = vcvt.s32.f32 %v1038_v54  ;;  %v2892_v57 = vcvt.s32.f32 %v1052_v16 }
 0x1a5   : > { %v2895_v2 = vsel %vm806_vm2, %v2772_v19, 128  ;;  %v2898_v62 = vsel %vm807_vm3, %v2772_v19, 128 }
 0x1a6   : > { %1041 = vmin.xlane.f32.xlu1 %v2890_v55  ;;  %1055 = vmin.xlane.f32.xlu0 %v2892_v57  ;;  %v1066_v3 = vshra.s32 %v2895_v2, 16  ;;  %v1080_v22 = vshra.s32 %v2898_v62, 16 }
 0x1a7   : > { %v762_v63 = vpop.xlane.xlu1 %761  ;;  %v764_v23 = vpop.xlane.xlu0 %763 }
 0x1a8   : > { %vm808_vm4 = vcmp.eq.f32.partialorder %v2713_v28, %v762_v63  ;;  %vm809_vm5 = vcmp.eq.f32.partialorder %v2716_v29, %v764_v23  ;;  %v2906_v20 = vcvt.s32.f32 %v1066_v3  ;;  %v2908_v4 = vcvt.s32.f32 %v1080_v22 }
 0x1a9   : > { %v2911_v24 = vsel %vm808_vm4, %v2772_v19, 128  ;;  %v2914_v5 = vsel %vm809_vm5, %v2772_v19, 128 }
 0x1aa   : > { %1069 = vmin.xlane.f32.xlu1 %v2906_v20  ;;  %1083 = vmin.xlane.f32.xlu0 %v2908_v4  ;;  %v1094_v32 = vshra.s32 %v2911_v24, 16  ;;  %v1108_v28 = vshra.s32 %v2914_v5, 16 }
 0x1ab   : > { %v766_v10 = vpop.xlane.xlu1 %765  ;;  %v768_v29 = vpop.xlane.xlu0 %767 }
 0x1ac   : > { %vm810_vm6 = vcmp.eq.f32.partialorder %v2721_v34, %v766_v10  ;;  %vm811_vm7 = vcmp.eq.f32.partialorder %v2724_v36, %v768_v29  ;;  %v2922_v33 = vcvt.s32.f32 %v1094_v32  ;;  %v2924_v11 = vcvt.s32.f32 %v1108_v28 }
 0x1ad   : > { %v2927_v54 = vsel %vm810_vm6, %v2772_v19, 128  ;;  %v2930_v16 = vsel %vm811_vm7, %v2772_v19, 128 }
 0x1ae   : > { %1097 = vmin.xlane.f32.xlu1 %v2922_v33  ;;  %1111 = vmin.xlane.f32.xlu0 %v2924_v11  ;;  %v1122_v56 = vshra.s32 %v2927_v54, 16  ;;  %v1136_v34 = vshra.s32 %v2930_v16, 16 }
 0x1af   : > { %v770_v17 = vpop.xlane.xlu1 %769  ;;  %v772_v36 = vpop.xlane.xlu0 %771 }
 0x1b0   : > { %vm812_vm8 = vcmp.eq.f32.partialorder %v2729_v42, %v770_v17  ;;  %vm813_vm9 = vcmp.eq.f32.partialorder %v2732_v43, %v772_v36  ;;  %v2938_v3 = vcvt.s32.f32 %v1122_v56  ;;  %v2940_v22 = vcvt.s32.f32 %v1136_v34 }
 0x1b1   : > { %v2943_v63 = vsel %vm812_vm8, %v2772_v19, 128  ;;  %v2946_v23 = vsel %vm813_vm9, %v2772_v19, 128 }
 0x1b2   : > { %1125 = vmin.xlane.f32.xlu1 %v2938_v3  ;;  %1139 = vmin.xlane.f32.xlu0 %v2940_v22  ;;  %v1150_v32 = vshra.s32 %v2943_v63, 16  ;;  %v1164_v42 = vshra.s32 %v2946_v23, 16 }
 0x1b3   : > { %v774_v28 = vpop.xlane.xlu1 %773  ;;  %v776_v43 = vpop.xlane.xlu0 %775 }
 0x1b4   : > { %vm814_vm10 = vcmp.eq.f32.partialorder %v2737_v52, %v774_v28  ;;  %vm815_vm11 = vcmp.eq.f32.partialorder %v2740_v53, %v776_v43  ;;  %v2954_v10 = vcvt.s32.f32 %v1150_v32  ;;  %v2956_v29 = vcvt.s32.f32 %v1164_v42 }
 0x1b5   : > { %v2959_v56 = vsel %vm814_vm10, %v2772_v19, 128  ;;  %v2962_v34 = vsel %vm815_vm11, %v2772_v19, 128 }
 0x1b6   : > { %3625 = vst [vmem:[#allocation11_spill] sm:$0xff] %v2956_v29  ;;  %1153 = vmin.xlane.f32.xlu1 %v2954_v10  ;;  %1167 = vmin.xlane.f32.xlu0 %v2956_v29  ;;  %v1178_v17 = vshra.s32 %v2959_v56, 16  ;;  %v1192_v52 = vshra.s32 %v2962_v34, 16 }
 0x1b7   : > { %v778_v36 = vpop.xlane.xlu1 %777  ;;  %v780_v53 = vpop.xlane.xlu0 %779 }
 0x1b8   : > { %vm816_vm12 = vcmp.eq.f32.partialorder %v2745_v60, %v778_v36  ;;  %vm817_vm13 = vcmp.eq.f32.partialorder %v2748_v61, %v780_v53  ;;  %v2970_v32 = vcvt.s32.f32 %v1178_v17  ;;  %v2972_v42 = vcvt.s32.f32 %v1192_v52 }
 0x1b9   : > { %v2975_v28 = vsel %vm816_vm12, %v2772_v19, 128  ;;  %v2978_v43 = vsel %vm817_vm13, %v2772_v19, 128 }
 0x1ba   : > { %3626 = vst [vmem:[#allocation12_spill] sm:$0xff] %v2970_v32  ;;  %3627 = vst [vmem:[#allocation13_spill] sm:$0xff] %v2972_v42  ;;  %1181 = vmin.xlane.f32.xlu1 %v2970_v32  ;;  %1195 = vmin.xlane.f32.xlu0 %v2972_v42  ;;  %v1206_v29 = vshra.s32 %v2975_v28, 16  ;;  %v1220_v60 = vshra.s32 %v2978_v43, 16 }
 0x1bb   : > { %3628 = vst [vmem:[#allocation14_spill] sm:$0xff] %v2975_v28  ;;  %3629 = vst [vmem:[#allocation15_spill] sm:$0xff] %v2978_v43  ;;  %v782_v36 = vpop.xlane.xlu1 %781  ;;  %v784_v61 = vpop.xlane.xlu0 %783 }
 0x1bc   : > { %vm818_vm14 = vcmp.eq.f32.partialorder %v2753_v6, %v782_v36  ;;  %vm819_vm15 = vcmp.eq.f32.partialorder %v2756_v7, %v784_v61  ;;  %v2986_v17 = vcvt.s32.f32 %v1206_v29  ;;  %v2988_v52 = vcvt.s32.f32 %v1220_v60 }
 0x1bd   : > { %v2991_v53 = vsel %vm818_vm14, %v2772_v19, 128  ;;  %v2994_v32 = vsel %vm819_vm15, %v2772_v19, 128 }
 0x1be   : > { %3630 = vst [vmem:[#allocation16_spill] sm:$0xff] %v2986_v17  ;;  %3631 = vst [vmem:[#allocation17_spill] sm:$0xff] %v2988_v52  ;;  %1209 = vmin.xlane.f32.xlu1 %v2986_v17  ;;  %1223 = vmin.xlane.f32.xlu0 %v2988_v52  ;;  %v1234_v42 = vshra.s32 %v2991_v53, 16  ;;  %v1248_v6 = vshra.s32 %v2994_v32, 16 }
 0x1bf   : > { %3632 = vst [vmem:[#allocation18_spill] sm:$0xff] %v2991_v53  ;;  %3633 = vst [vmem:[#allocation19_spill] sm:$0xff] %v2994_v32  ;;  %v786_v36 = vpop.xlane.xlu1 %785  ;;  %v788_v7 = vpop.xlane.xlu0 %787 }
 0x1c0   : > { %vm820_vm0 = vcmp.eq.f32.partialorder %v2764_v14, %v786_v36  ;;  %vm821_vm2 = vcmp.eq.f32.partialorder %v2767_v15, %v788_v7  ;;  %v3002_v29 = vcvt.s32.f32 %v1234_v42  ;;  %v3004_v60 = vcvt.s32.f32 %v1248_v6 }
 0x1c1   : > { %v3007_v61 = vsel %vm820_vm0, %v2772_v19, 128  ;;  %v3010_v17 = vsel %vm821_vm2, %v2772_v19, 128 }
 0x1c2   : > { %3634 = vst [vmem:[#allocation20_spill] sm:$0xff] %v3002_v29  ;;  %3635 = vst [vmem:[#allocation21_spill] sm:$0xff] %v3004_v60  ;;  %1237 = vmin.xlane.f32.xlu1 %v3002_v29  ;;  %1251 = vmin.xlane.f32.xlu0 %v3004_v60  ;;  %v1262_v52 = vshra.s32 %v3007_v61, 16  ;;  %v1276_v14 = vshra.s32 %v3010_v17, 16  ;;  %v911_v29 = vand.u32 65535, %v2802_v38  ;;  %v939_v38 = vand.u32 65535, %v2818_v49 }
 0x1c3   : > { %3636 = vst [vmem:[#allocation22_spill] sm:$0xff] %v3007_v61  ;;  %3637 = vst [vmem:[#allocation23_spill] sm:$0xff] %v3010_v17  ;;  %v790_v36 = vpop.xlane.xlu1 %789 }
 0x1c4   : > { %vm822_vm3 = vcmp.eq.f32.partialorder %v2761_v13, %v790_v36  ;;  %v3017_v15 = vcvt.s32.f32 %v1262_v52  ;;  %v3019_v42 = vcvt.s32.f32 %v1276_v14  ;;  %v312_v13 = vld [vmem:[%s3587_s2] sm:$0xff]  ;;  %v313_v52 = vld [vmem:[%s3587_s2 + $0x8] sm:$0xff]  ;;  %v315_v36 = vld [vmem:[%s3587_s2 + $0x18] sm:$0xff] }
 0x1c5   : > { %v3022_v6 = vsel %vm822_vm3, %v2772_v19, 128  ;;  %v314_v19 = vld [vmem:[%s3587_s2 + $0x10] sm:$0xff]  ;;  %v2292_v14 = vpack.c.bf16 %v313_v52, %v312_v13  ;;  %v319_v52 = vld [vmem:[%s3587_s2 + $0x38] sm:$0xff] }
 0x1c6   : > { %3638 = vst [vmem:[#allocation24_spill] sm:$0xff] %v3017_v15  ;;  %3639 = vst [vmem:[#allocation25_spill] sm:$0xff] %v3019_v42  ;;  %1265 = vmin.xlane.f32.xlu1 %v3017_v15  ;;  %1279 = vmin.xlane.f32.xlu0 %v3019_v42  ;;  %v1290_v7 = vshra.s32 %v3022_v6, 16  ;;  %v317_v42 = vld [vmem:[%s3587_s2 + $0x28] sm:$0xff]  ;;  %v318_v13 = vld [vmem:[%s3587_s2 + $0x30] sm:$0xff] }
 0x1c7   : > { %3640 = vst [vmem:[#allocation26_spill] sm:$0xff] %v3022_v6  ;;  %2293 = vmatprep.subr.bf16.mxu0 %v2292_v14  ;;  %2324 = vmatprep.subr.bf16.mxu1 %v2292_v14  ;;  %v883_v6 = vand.u32 65535, %v2787_v30 }
 0x1c8   : > { %v3027_v60 = vcvt.s32.f32 %v1290_v7  ;;  %v2296_v7 = vpack.c.bf16 %v315_v36, %v314_v19  ;;  %2295 = vmatpush3.bf16.msra.mxu0 %v2292_v14  ;;  %2332 = vmatpush3.bf16.msra.mxu1 %v2292_v14  ;;  %v2304_v19 = vpack.c.bf16 %v319_v52, %v318_v13  ;;  %v320_v14 = vld [vmem:[%s3587_s2 + $0x40] sm:$0xff]  ;;  %v322_v36 = vld [vmem:[%s3587_s2 + $0x50] sm:$0xff]  ;;  %v325_v52 = vld [vmem:[%s3587_s2 + $0x68] sm:$0xff] }
 0x1ca   : > { %3641 = vst [vmem:[#allocation27_spill] sm:$0xff] %v3027_v60  ;;  %1293 = vmin.xlane.f32.xlu1 %v3027_v60  ;;  %v316_v60 = vld [vmem:[%s3587_s2 + $0x20] sm:$0xff]  ;;  %2297 = vmatprep.subr.bf16.mxu0 %v2296_v7 }
 0x1cb   : > { %v2300_v15 = vpack.c.bf16 %v317_v42, %v316_v60  ;;  %2325 = vmatprep.subr.bf16.mxu1 %v2296_v7  ;;  %v321_v60 = vld [vmem:[%s3587_s2 + $0x48] sm:$0xff] }
 0x1cc   : > { %2299 = vmatpush3.bf16.msra.mxu0 %v2296_v7  ;;  %2333 = vmatpush3.bf16.msra.mxu1 %v2296_v7  ;;  %v2308_v42 = vpack.c.bf16 %v321_v60, %v320_v14  ;;  %v323_v7 = vld [vmem:[%s3587_s2 + $0x58] sm:$0xff] }
 0x1cd   : > { %2301 = vmatprep.subr.bf16.mxu0 %v2300_v15  ;;  %2326 = vmatprep.subr.bf16.mxu1 %v2300_v15  ;;  %v2312_v13 = vpack.c.bf16 %v323_v7, %v322_v36  ;;  %v869_v7 = vand.u32 65535, %v2784_v27 }
 0x1d0   : > { %2303 = vmatpush3.bf16.msra.mxu0 %v2300_v15  ;;  %2334 = vmatpush3.bf16.msra.mxu1 %v2300_v15  ;;  %v324_v15 = vld [vmem:[%s3587_s2 + $0x60] sm:$0xff] }
 0x1d1   : > { %2305 = vmatprep.subr.bf16.mxu0 %v2304_v19  ;;  %2327 = vmatprep.subr.bf16.mxu1 %v2304_v19  ;;  %v2316_v14 = vpack.c.bf16 %v325_v52, %v324_v15  ;;  %v871_v52 = vcvt.s32.f32 %v869_v7 }
 0x1d4   : > { %2307 = vmatpush3.bf16.msra.mxu0 %v2304_v19  ;;  %2335 = vmatpush3.bf16.msra.mxu1 %v2304_v19  ;;  %v855_v19 = vand.u32 65535, %v2776_v21  ;;  %v897_v21 = vand.u32 65535, %v2799_v37  ;;  %v925_v37 = vand.u32 65535, %v2815_v48 }
 0x1d5   : > { %2309 = vmatprep.subr.bf16.mxu0 %v2308_v42  ;;  %2328 = vmatprep.subr.bf16.mxu1 %v2308_v42 }
 0x1d6   : > { %v857_v36 = vcvt.s32.f32 %v855_v19  ;;  %v899_v7 = vcvt.s32.f32 %v897_v21  ;;  %v927_v21 = vcvt.s32.f32 %v925_v37 }
 0x1d8   : > { %2311 = vmatpush3.bf16.msra.mxu0 %v2308_v42  ;;  %2336 = vmatpush3.bf16.msra.mxu1 %v2308_v42 }
 0x1d9   : > { %2313 = vmatprep.subr.bf16.mxu0 %v2312_v13  ;;  %2329 = vmatprep.subr.bf16.mxu1 %v2312_v13 }
 0x1dc   : > { %2315 = vmatpush3.bf16.msra.mxu0 %v2312_v13  ;;  %2337 = vmatpush3.bf16.msra.mxu1 %v2312_v13 }
 0x1dd   : > { %2317 = vmatprep.subr.bf16.mxu0 %v2316_v14  ;;  %2330 = vmatprep.subr.bf16.mxu1 %v2316_v14 }
 0x1e0   : > { %2319 = vmatpush3.bf16.msra.mxu0 %v2316_v14  ;;  %2338 = vmatpush3.bf16.msra.mxu1 %v2316_v14  ;;  %v885_v14 = vcvt.s32.f32 %v883_v6  ;;  %v913_v6 = vcvt.s32.f32 %v911_v29  ;;  %v941_v29 = vcvt.s32.f32 %v939_v38 }
 0x217   : > { %v3073_v60 = vpop.xlane.xlu0 %859 }
 0x218   : > { %vm861_vm4 = vcmp.eq.f32.partialorder %v2781_v26, %v3073_v60 }
 0x219   : > { %v862_v42 = vsel %vm861_vm4, %v857_v36, inf }
 0x21a   : > { %863 = vmin.xlane.f32.xlu0 %v862_v42 }
 0x21b   : > { %v3079_v15 = vpop.xlane.xlu1 %873  ;;  %v3081_v13 = vpop.xlane.xlu0 %887 }
 0x21c   : > { %vm875_vm5 = vcmp.eq.f32.partialorder %v2794_v44, %v3079_v15  ;;  %vm889_vm6 = vcmp.eq.f32.partialorder %v2796_v45, %v3081_v13 }
 0x21d   : > { %v876_v19 = vsel %vm875_vm5, %v871_v52, inf  ;;  %v890_v26 = vsel %vm889_vm6, %v885_v14, inf }
 0x21e   : > { %877 = vmin.xlane.f32.xlu1 %v876_v19  ;;  %891 = vmin.xlane.f32.xlu0 %v890_v26  ;;  %v953_v19 = vand.u32 65535, %v2831_v0  ;;  %v967_v26 = vand.u32 65535, %v2834_v1 }
 0x21f   : > { %v3089_v36 = vpop.xlane.xlu1 %901  ;;  %v3091_v42 = vpop.xlane.xlu0 %915 }
 0x220   : > { %vm903_vm7 = vcmp.eq.f32.partialorder %v2810_v46, %v3089_v36  ;;  %vm917_vm8 = vcmp.eq.f32.partialorder %v2812_v47, %v3091_v42  ;;  %v955_v37 = vcvt.s32.f32 %v953_v19  ;;  %v969_v38 = vcvt.s32.f32 %v967_v26 }
 0x221   : > { %v904_v44 = vsel %vm903_vm7, %v899_v7, inf  ;;  %v918_v45 = vsel %vm917_vm8, %v913_v6, inf }
 0x222   : > { %905 = vmin.xlane.f32.xlu1 %v904_v44  ;;  %919 = vmin.xlane.f32.xlu0 %v918_v45  ;;  %v981_v44 = vand.u32 65535, %v2847_v12  ;;  %v995_v45 = vand.u32 65535, %v2850_v18  ;;  %v1051_v18 = vand.u32 65535, %v2882_v51 }
 0x223   : > { %v3099_v52 = vpop.xlane.xlu1 %929  ;;  %v3101_v14 = vpop.xlane.xlu0 %943 }
 0x224   : > { %vm931_vm9 = vcmp.eq.f32.partialorder %v2826_v58, %v3099_v52  ;;  %vm945_vm10 = vcmp.eq.f32.partialorder %v2828_v59, %v3101_v14  ;;  %v983_v19 = vcvt.s32.f32 %v981_v44  ;;  %v997_v26 = vcvt.s32.f32 %v995_v45 }
 0x225   : > { %v932_v46 = vsel %vm931_vm9, %v927_v21, inf  ;;  %v946_v47 = vsel %vm945_vm10, %v941_v29, inf }
 0x226   : > { %933 = vmin.xlane.f32.xlu1 %v932_v46  ;;  %947 = vmin.xlane.f32.xlu0 %v946_v47  ;;  %v1009_v46 = vand.u32 65535, %v2863_v39  ;;  %v1023_v47 = vand.u32 65535, %v2866_v31  ;;  %v1037_v39 = vand.u32 65535, %v2879_v41 }
 0x227   : > { %v3109_v7 = vpop.xlane.xlu1 %957  ;;  %v3111_v6 = vpop.xlane.xlu0 %971 }
 0x228   : > { %vm959_vm11 = vcmp.eq.f32.partialorder %v2842_v8, %v3109_v7  ;;  %vm973_vm12 = vcmp.eq.f32.partialorder %v2844_v9, %v3111_v6  ;;  %v326_v8 = vld [vmem:[%s3587_s2 + $0x70] sm:$0xff]  ;;  %v327_v9 = vld [vmem:[%s3587_s2 + $0x78] sm:$0xff]  ;;  %v1025_v31 = vcvt.s32.f32 %v1023_v47  ;;  %v1053_v47 = vcvt.s32.f32 %v1051_v18 }
 0x229   : > { %v960_v58 = vsel %vm959_vm11, %v955_v37, inf  ;;  %v974_v59 = vsel %vm973_vm12, %v969_v38, inf  ;;  %v2320_v44 = vpack.c.bf16 %v327_v9, %v326_v8  ;;  %v1065_v8 = vand.u32 65535, %v2895_v2 }
 0x22a   : > { %961 = vmin.xlane.f32.xlu1 %v960_v58  ;;  %975 = vmin.xlane.f32.xlu0 %v974_v59  ;;  %v1011_v59 = vcvt.s32.f32 %v1009_v46  ;;  %v1039_v46 = vcvt.s32.f32 %v1037_v39  ;;  %v1079_v9 = vand.u32 65535, %v2898_v62 }
 0x22b   : > { %v3119_v21 = vpop.xlane.xlu1 %985  ;;  %v3121_v29 = vpop.xlane.xlu0 %999  ;;  %2321 = vmatprep.subr.bf16.mxu0 %v2320_v44  ;;  %2331 = vmatprep.subr.bf16.mxu1 %v2320_v44  ;;  %v1067_v39 = vcvt.s32.f32 %v1065_v8  ;;  %v1135_v8 = vand.u32 65535, %v2930_v16 }
 0x22c   : > { %vm987_vm13 = vcmp.eq.f32.partialorder %v2858_v25, %v3119_v21  ;;  %vm1001_vm14 = vcmp.eq.f32.partialorder %v2860_v35, %v3121_v29  ;;  %2323 = vmatpush3.bf16.msra.mxu0 %v2320_v44  ;;  %2339 = vmatpush3.bf16.msra.mxu1 %v2320_v44  ;;  %v1081_v18 = vcvt.s32.f32 %v1079_v9  ;;  %v1107_v44 = vand.u32 65535, %v2914_v5 }
 0x22d   : > { %v988_v37 = vsel %vm987_vm13, %v983_v19, inf  ;;  %v1002_v38 = vsel %vm1001_vm14, %v997_v26, inf }
 0x22e   : > { %989 = vmin.xlane.f32.xlu1 %v988_v37  ;;  %1003 = vmin.xlane.f32.xlu0 %v1002_v38  ;;  %v1093_v38 = vand.u32 65535, %v2911_v24 }
 0x22f   : > { %v3135_v45 = vpop.xlane.xlu1 %1013  ;;  %v3137_v58 = vpop.xlane.xlu0 %1027 }
 0x230   : > { %vm1015_vm15 = vcmp.eq.f32.partialorder %v2874_v40, %v3135_v45  ;;  %vm1029_vm0 = vcmp.eq.f32.partialorder %v2876_v50, %v3137_v58 }
 0x231   : > { %v1016_v25 = vsel %vm1015_vm15, %v1011_v59, inf  ;;  %v1030_v35 = vsel %vm1029_vm0, %v1025_v31, inf }
 0x232   : > { %1017 = vmin.xlane.f32.xlu1 %v1016_v25  ;;  %1031 = vmin.xlane.f32.xlu0 %v1030_v35  ;;  %v1095_v35 = vcvt.s32.f32 %v1093_v38  ;;  %v1163_v38 = vand.u32 65535, %v2946_v23 }
 0x233   : > { %v3145_v19 = vpop.xlane.xlu1 %1041  ;;  %v3147_v26 = vpop.xlane.xlu0 %1055 }
 0x234   : > { %vm1043_vm2 = vcmp.eq.f32.partialorder %v2890_v55, %v3145_v19  ;;  %vm1057_vm3 = vcmp.eq.f32.partialorder %v2892_v57, %v3147_v26 }
 0x235   : > { %v1044_v40 = vsel %vm1043_vm2, %v1039_v46, inf  ;;  %v1058_v31 = vsel %vm1057_vm3, %v1053_v47, inf  ;;  %v1109_v46 = vcvt.s32.f32 %v1107_v44  ;;  %v1121_v47 = vand.u32 65535, %v2927_v54 }
 0x236   : > { %1045 = vmin.xlane.f32.xlu1 %v1044_v40  ;;  %1059 = vmin.xlane.f32.xlu0 %v1058_v31 }
 0x237   : > { %v3155_v50 = vpop.xlane.xlu1 %1069  ;;  %v3157_v37 = vpop.xlane.xlu0 %1083  ;;  %v1123_v31 = vcvt.s32.f32 %v1121_v47  ;;  %v1191_v47 = vand.u32 65535, %v2962_v34 }
 0x238   : > { %vm1071_vm4 = vcmp.eq.f32.partialorder %v2906_v20, %v3155_v50  ;;  %vm1085_vm5 = vcmp.eq.f32.partialorder %v2908_v4, %v3157_v37 }
 0x239   : > { %v1072_v55 = vsel %vm1071_vm4, %v1067_v39, inf  ;;  %v1086_v57 = vsel %vm1085_vm5, %v1081_v18, inf  ;;  %v1137_v39 = vcvt.s32.f32 %v1135_v8  ;;  %v1149_v18 = vand.u32 65535, %v2943_v63 }
 0x23a   : > { %1073 = vmin.xlane.f32.xlu1 %v1072_v55  ;;  %1087 = vmin.xlane.f32.xlu0 %v1086_v57 }
 0x23b   : > { %v3165_v59 = vpop.xlane.xlu1 %1097  ;;  %v3167_v25 = vpop.xlane.xlu0 %1111  ;;  %v1151_v57 = vcvt.s32.f32 %v1149_v18  ;;  %v1205_v18 = vand.u32 65535, %v2975_v28 }
 0x23c   : > { %vm1099_vm6 = vcmp.eq.f32.partialorder %v2922_v33, %v3165_v59  ;;  %vm1113_vm7 = vcmp.eq.f32.partialorder %v2924_v11, %v3167_v25 }
 0x23d   : > { %v1100_v20 = vsel %vm1099_vm6, %v1095_v35, inf  ;;  %v1114_v4 = vsel %vm1113_vm7, %v1109_v46, inf  ;;  %v1165_v35 = vcvt.s32.f32 %v1163_v38  ;;  %v1177_v46 = vand.u32 65535, %v2959_v56 }
 0x23e   : > { %1101 = vmin.xlane.f32.xlu1 %v1100_v20  ;;  %1115 = vmin.xlane.f32.xlu0 %v1114_v4  ;;  %v1219_v38 = vand.u32 65535, %v2978_v43  ;;  %v3645_v43 = vld [vmem:[#allocation16_spill] sm:$0xff]  ;;  %vm1792_vm6 = vcmask 7168  }
 0x23f   : > { %v3175_v9 = vpop.xlane.xlu1 %1125  ;;  %v3177_v40 = vpop.xlane.xlu0 %1139 }
 0x240   : > { %vm1127_vm8 = vcmp.eq.f32.partialorder %v2938_v3, %v3175_v9  ;;  %vm1141_vm9 = vcmp.eq.f32.partialorder %v2940_v22, %v3177_v40  ;;  %v3642_v3 = vld [vmem:[#allocation11_spill] sm:$0xff] }
 0x241   : > { %v1128_v33 = vsel %vm1127_vm8, %v1123_v31, inf  ;;  %v1142_v11 = vsel %vm1141_vm9, %v1137_v39, inf  ;;  %v1179_v31 = vcvt.s32.f32 %v1177_v46  ;;  %v1193_v39 = vcvt.s32.f32 %v1191_v47 }
 0x242   : > { %1129 = vmin.xlane.f32.xlu1 %v1128_v33  ;;  %1143 = vmin.xlane.f32.xlu0 %v1142_v11  ;;  %v3643_v33 = vld [vmem:[#allocation12_spill] sm:$0xff]  ;;  %v1207_v46 = vcvt.s32.f32 %v1205_v18  ;;  %v1221_v47 = vcvt.s32.f32 %v1219_v38 }
 0x243   : > { %v3185_v44 = vpop.xlane.xlu1 %1153  ;;  %v3187_v55 = vpop.xlane.xlu0 %1167 }
 0x244   : > { %vm1155_vm10 = vcmp.eq.f32.partialorder %v2954_v10, %v3185_v44  ;;  %vm1169_vm11 = vcmp.eq.f32.partialorder %v3642_v3, %v3187_v55  ;;  %v3644_v10 = vld [vmem:[#allocation13_spill] sm:$0xff] }
 0x245   : > { %v1156_v22 = vsel %vm1155_vm10, %v1151_v57, inf  ;;  %v1170_v8 = vsel %vm1169_vm11, %v1165_v35, inf }
 0x246   : > { %1157 = vmin.xlane.f32.xlu1 %v1156_v22  ;;  %1171 = vmin.xlane.f32.xlu0 %v1170_v8  ;;  %v1233_v22 = vand.u32 65535, %v2991_v53  ;;  %v1247_v8 = vand.u32 65535, %v2994_v32  ;;  %v1275_v32 = vand.u32 65535, %v3010_v17  ;;  %v3647_v53 = vld [vmem:[#allocation20_spill] sm:$0xff] }
 0x247   : > { %v3195_v20 = vpop.xlane.xlu1 %1181  ;;  %v3197_v4 = vpop.xlane.xlu0 %1195  ;;  %v3650_v17 = vld [vmem:[#allocation24_spill] sm:$0xff] }
 0x248   : > { %vm1183_vm12 = vcmp.eq.f32.partialorder %v3643_v33, %v3195_v20  ;;  %vm1197_vm13 = vcmp.eq.f32.partialorder %v3644_v10, %v3197_v4  ;;  %v3646_v33 = vld [vmem:[#allocation17_spill] sm:$0xff]  ;;  %v1235_v18 = vcvt.s32.f32 %v1233_v22  ;;  %v1249_v38 = vcvt.s32.f32 %v1247_v8 }
 0x249   : > { %v1184_v11 = vsel %vm1183_vm12, %v1179_v31, inf  ;;  %v1198_v57 = vsel %vm1197_vm13, %v1193_v39, inf  ;;  %v1277_v8 = vcvt.s32.f32 %v1275_v32 }
 0x24a   : > { %1185 = vmin.xlane.f32.xlu1 %v1184_v11  ;;  %1199 = vmin.xlane.f32.xlu0 %v1198_v57  ;;  %v1261_v57 = vand.u32 65535, %v3007_v61 }
 0x24b   : > { %v3205_v35 = vpop.xlane.xlu1 %1209  ;;  %v3207_v3 = vpop.xlane.xlu0 %1223 }
 0x24c   : > { %vm1211_vm14 = vcmp.eq.f32.partialorder %v3645_v43, %v3205_v35  ;;  %vm1225_vm15 = vcmp.eq.f32.partialorder %v3646_v33, %v3207_v3  ;;  %v3648_v43 = vld [vmem:[#allocation21_spill] sm:$0xff]  ;;  %v1263_v22 = vcvt.s32.f32 %v1261_v57  ;;  %v866_v57 = vcvt.f32.s32 %v3073_v60 }
 0x24d   : > { %v1212_v31 = vsel %vm1211_vm14, %v1207_v46, inf  ;;  %v1226_v39 = vsel %vm1225_vm15, %v1221_v47, inf  ;;  %v922_v60 = vcvt.f32.s32 %v3091_v42  ;;  %v936_v42 = vcvt.f32.s32 %v3099_v52 }
 0x24e   : > { %1213 = vmin.xlane.f32.xlu1 %v1212_v31  ;;  %1227 = vmin.xlane.f32.xlu0 %v1226_v39  ;;  %v3649_v39 = vld [vmem:[#allocation26_spill] sm:$0xff]  ;;  %v867_v28 = vshll.u32 %v866_v57, 16 }
 0x24f   : > { %v3215_v10 = vpop.xlane.xlu1 %1237  ;;  %v3217_v11 = vpop.xlane.xlu0 %1251  ;;  %v1289_v61 = vand.u32 65535, %v3649_v39 }
 0x250   : > { %vm1239_vm0 = vcmp.eq.f32.partialorder %v3647_v53, %v3215_v10  ;;  %vm1253_vm2 = vcmp.eq.f32.partialorder %v3648_v43, %v3217_v11  ;;  %v3651_v53 = vld [vmem:[#allocation25_spill] sm:$0xff] }
 0x251   : > { %v1240_v46 = vsel %vm1239_vm0, %v1235_v18, inf  ;;  %v1254_v47 = vsel %vm1253_vm2, %v1249_v38, inf }
 0x252   : > { %1241 = vmin.xlane.f32.xlu1 %v1240_v46  ;;  %1255 = vmin.xlane.f32.xlu0 %v1254_v47  ;;  %v1291_v46 = vcvt.s32.f32 %v1289_v61  ;;  %v3653_v47 = vld [vmem:[#allocation27_spill] sm:$0xff] }
 0x253   : > { %v3225_v33 = vpop.xlane.xlu1 %1265  ;;  %v3227_v31 = vpop.xlane.xlu0 %1279 }
 0x254   : > { %vm1267_vm3 = vcmp.eq.f32.partialorder %v3650_v17, %v3225_v33  ;;  %vm1281_vm4 = vcmp.eq.f32.partialorder %v3651_v53, %v3227_v31  ;;  %v880_v17 = vcvt.f32.s32 %v3079_v15  ;;  %v894_v53 = vcvt.f32.s32 %v3081_v13 }
 0x255   : > { %v1268_v43 = vsel %vm1267_vm3, %v1263_v22, inf  ;;  %v1282_v18 = vsel %vm1281_vm4, %v1277_v8, inf }
 0x256   : > { %1269 = vmin.xlane.f32.xlu1 %v1268_v43  ;;  %1283 = vmin.xlane.f32.xlu0 %v1282_v18  ;;  %v881_v8 = vshll.u32 %v880_v17, 16  ;;  %v908_v43 = vcvt.f32.s32 %v3089_v36  ;;  %v923_v36 = vshll.u32 %v922_v60, 16  ;;  %v978_v60 = vcvt.f32.s32 %v3111_v6 }
 0x257   : > { %v3234_v38 = vpop.xlane.xlu1 %1293 }
 0x258   : > { %3652 = vst [vmem:[#allocation11_spill] sm:$0xff] %v3234_v38  ;;  %vm1295_vm5 = vcmp.eq.f32.partialorder %v3653_v47, %v3234_v38  ;;  %v3654_v47 = vld [vmem:[#allocation5_spill] sm:$0xff]  ;;  %v909_v17 = vshll.u32 %v908_v43, 16 }
 0x259   : > { %v1296_v32 = vsel %vm1295_vm5, %v1291_v46, inf  ;;  %v895_v46 = vshll.u32 %v894_v53, 16 }
 0x25a   : > { %1297 = vmin.xlane.f32.xlu1 %v1296_v32  ;;  %v2478_v32 = vmov 1.0  }
 0x2a7   : > { %v864_v39 = vpop.xlane.xlu0 %863 }
 0x2a8   : > { %v865_v22 = vcvt.f32.s32 %v864_v39 }
 0x2aa   : > { %v868_v61 = vadd.s32 %v867_v28, %v865_v22  ;;  %v950_v22 = vcvt.f32.s32 %v3101_v14  ;;  %v937_v14 = vshll.u32 %v936_v42, 16 }
 0x2ab   : > { %v878_v18 = vpop.xlane.xlu1 %877  ;;  %v892_v15 = vpop.xlane.xlu0 %891 }
 0x2ac   : > { %1793 = vst.msk [vmem:[%s3245_s11] sm:$0xff] %vm1792_vm6, %v868_v61  ;;  %v879_v13 = vcvt.f32.s32 %v878_v18  ;;  %v893_v39 = vcvt.f32.s32 %v892_v15  ;;  %vm1303_vm7 = vcmp.eq.s32.totalorder %v3654_v47, %v868_v61  ;;  %v951_v43 = vshll.u32 %v950_v22, 16 }
 0x2ad   : > { %2244 = vmatprep.mubr.msk.f32.mxu0 %vm1303_vm7, %v2478_v32 }
 0x2ae   : > { %v882_v28 = vadd.s32 %v881_v8, %v879_v13  ;;  %v896_v57 = vadd.s32 %v895_v46, %v893_v39  ;;  %v3655_v13 = vld [vmem:[#allocation6_spill] sm:$0xff]  ;;  %v3656_v39 = vld [vmem:[#allocation7_spill] sm:$0xff] }
 0x2af   : > { %v906_v53 = vpop.xlane.xlu1 %905  ;;  %v920_v38 = vpop.xlane.xlu0 %919 }
 0x2b0   : > { %vm1304_vm8 = vcmp.eq.s32.totalorder %v2784_v27, %v882_v28  ;;  %1794 = vst.msk [vmem:[%s3245_s11 + $0x8] sm:$0xff] %vm1792_vm6, %v882_v28  ;;  %1795 = vst.msk [vmem:[%s3245_s11 + $0x10] sm:$0xff] %vm1792_vm6, %v896_v57  ;;  %v907_v61 = vcvt.f32.s32 %v906_v53  ;;  %v921_v18 = vcvt.f32.s32 %v920_v38  ;;  %vm1305_vm9 = vcmp.eq.s32.totalorder %v2787_v30, %v896_v57 }
 0x2b1   : > { %2245 = vmatmul.mubr.msk.f32.vlgmr.msra.gmra.mrb[32].mxu0 %vm1304_vm8, %v2478_v32  ;;  %v964_v27 = vcvt.f32.s32 %v3109_v7  ;;  %v979_v28 = vshll.u32 %v978_v60, 16  ;;  %v992_v57 = vcvt.f32.s32 %v3119_v21 }
 0x2b2   : > { %v910_v8 = vadd.s32 %v909_v17, %v907_v61  ;;  %v924_v52 = vadd.s32 %v923_v36, %v921_v18  ;;  %2247 = vmatprep.mubr.msk.f32.mxu0 %vm1305_vm9, %v2478_v32  ;;  %v1006_v17 = vcvt.f32.s32 %v3121_v29 }
 0x2b3   : > { %v934_v15 = vpop.xlane.xlu1 %933  ;;  %v948_v46 = vpop.xlane.xlu0 %947  ;;  %v965_v6 = vshll.u32 %v964_v27, 16  ;;  %v993_v61 = vshll.u32 %v992_v57, 16 }
 0x2b4   : > { %1796 = vst.msk [vmem:[%s3245_s11 + $0x18] sm:$0xff] %vm1792_vm6, %v910_v8  ;;  %1797 = vst.msk [vmem:[%s3245_s11 + $0x20] sm:$0xff] %vm1792_vm6, %v924_v52  ;;  %v935_v30 = vcvt.f32.s32 %v934_v15  ;;  %v949_v38 = vcvt.f32.s32 %v948_v46  ;;  %vm1306_vm10 = vcmp.eq.s32.totalorder %v3655_v13, %v910_v8  ;;  %vm1307_vm11 = vcmp.eq.s32.totalorder %v3656_v39, %v924_v52  ;;  %v3657_v13 = vld [vmem:[#allocation8_spill] sm:$0xff] }
 0x2b5   : > { %2248 = vmatmul.mubr.msk.f32.gmra.mrb[34].mxu0 %vm1306_vm10, %v2478_v32  ;;  %v1007_v18 = vshll.u32 %v1006_v17, 16  ;;  %v1020_v8 = vcvt.f32.s32 %v3135_v45  ;;  %v1034_v52 = vcvt.f32.s32 %v3137_v58  ;;  %v1048_v15 = vcvt.f32.s32 %v3145_v19 }
 0x2b6   : > { %v938_v47 = vadd.s32 %v937_v14, %v935_v30  ;;  %2250 = vmatprep.mubr.msk.f32.mxu0 %vm1307_vm11, %v2478_v32  ;;  %v952_v7 = vadd.s32 %v951_v43, %v949_v38  ;;  %v1062_v46 = vcvt.f32.s32 %v3147_v26 }
 0x2b7   : > { %v962_v36 = vpop.xlane.xlu1 %961  ;;  %v976_v42 = vpop.xlane.xlu0 %975  ;;  %v1021_v58 = vshll.u32 %v1020_v8, 16  ;;  %v1035_v60 = vshll.u32 %v1034_v52, 16  ;;  %v1049_v26 = vshll.u32 %v1048_v15, 16  ;;  %v1160_v15 = vcvt.f32.s32 %v3185_v44 }
 0x2b8   : > { %1798 = vst.msk [vmem:[%s3245_s11 + $0x28] sm:$0xff] %vm1792_vm6, %v938_v47  ;;  %v963_v22 = vcvt.f32.s32 %v962_v36  ;;  %v977_v53 = vcvt.f32.s32 %v976_v42  ;;  %vm1308_vm12 = vcmp.eq.s32.totalorder %v2815_v48, %v938_v47  ;;  %vm1309_vm13 = vcmp.eq.s32.totalorder %v2818_v49, %v952_v7  ;;  %1799 = vst.msk [vmem:[%s3245_s11 + $0x30] sm:$0xff] %vm1792_vm6, %v952_v7  ;;  %v3658_v36 = vld [vmem:[#allocation9_spill] sm:$0xff]  ;;  %v3659_v42 = vld [vmem:[#allocation10_spill] sm:$0xff] }
 0x2b9   : > { %2251 = vmatmul.mubr.msk.f32.gmra.mrb[36].mxu0 %vm1308_vm12, %v2478_v32  ;;  %2253 = vmatprep.mubr.msk.f32.mxu1 %vm1309_vm13, %v2478_v32  ;;  %v1063_v47 = vshll.u32 %v1062_v46, 16  ;;  %v1076_v7 = vcvt.f32.s32 %v3155_v50  ;;  %v1174_v46 = vcvt.f32.s32 %v3187_v55  ;;  %v1161_v55 = vshll.u32 %v1160_v15, 16 }
 0x2ba   : > { %v966_v21 = vadd.s32 %v965_v6, %v963_v22  ;;  %v980_v29 = vadd.s32 %v979_v28, %v977_v53  ;;  %v1090_v6 = vcvt.f32.s32 %v3157_v37 }
 0x2bb   : > { %v990_v14 = vpop.xlane.xlu1 %989  ;;  %v1004_v43 = vpop.xlane.xlu0 %1003  ;;  %v1077_v37 = vshll.u32 %v1076_v7, 16 }
 0x2bc   : > { %1800 = vst.msk [vmem:[%s3245_s11 + $0x38] sm:$0xff] %vm1792_vm6, %v966_v21  ;;  %1801 = vst.msk [vmem:[%s3245_s11 + $0x40] sm:$0xff] %vm1792_vm6, %v980_v29  ;;  %v991_v48 = vcvt.f32.s32 %v990_v14  ;;  %v1005_v49 = vcvt.f32.s32 %v1004_v43  ;;  %vm1310_vm14 = vcmp.eq.s32.totalorder %v2831_v0, %v966_v21  ;;  %vm1311_vm15 = vcmp.eq.s32.totalorder %v2834_v1, %v980_v29 }
 0x2bd   : > { %2254 = vmatmul.mubr.msk.f32.vlgmr.msra.gmra.mrb[0].mxu1 %vm1310_vm14, %v2478_v32  ;;  %v1091_v53 = vshll.u32 %v1090_v6, 16  ;;  %v1104_v21 = vcvt.f32.s32 %v3165_v59  ;;  %v1118_v29 = vcvt.f32.s32 %v3167_v25  ;;  %v1216_v6 = vcvt.f32.s32 %v3205_v35 }
 0x2be   : > { %v994_v27 = vadd.s32 %v993_v61, %v991_v48  ;;  %v1008_v45 = vadd.s32 %v1007_v18, %v1005_v49  ;;  %2256 = vmatprep.mubr.msk.f32.mxu1 %vm1311_vm15, %v2478_v32  ;;  %v1132_v48 = vcvt.f32.s32 %v3175_v9  ;;  %v1146_v49 = vcvt.f32.s32 %v3177_v40 }
 0x2bf   : > { %v1018_v30 = vpop.xlane.xlu1 %1017  ;;  %v1032_v38 = vpop.xlane.xlu0 %1031  ;;  %v1105_v25 = vshll.u32 %v1104_v21, 16  ;;  %v1119_v43 = vshll.u32 %v1118_v29, 16  ;;  %v1272_v29 = vcvt.f32.s32 %v3225_v33 }
 0x2c0   : > { %1802 = vst.msk [vmem:[%s3245_s11 + $0x48] sm:$0xff] %vm1792_vm6, %v994_v27  ;;  %1803 = vst.msk [vmem:[%s3245_s11 + $0x50] sm:$0xff] %vm1792_vm6, %v1008_v45  ;;  %v1019_v0 = vcvt.f32.s32 %v1018_v30  ;;  %v1033_v1 = vcvt.f32.s32 %v1032_v38  ;;  %vm1312_vm0 = vcmp.eq.s32.totalorder %v2847_v12, %v994_v27  ;;  %vm1313_vm2 = vcmp.eq.s32.totalorder %v3657_v13, %v1008_v45 }
 0x2c1   : > { %2257 = vmatmul.mubr.msk.f32.gmra.mrb[2].mxu1 %vm1312_vm0, %v2478_v32  ;;  %v1133_v40 = vshll.u32 %v1132_v48, 16  ;;  %v1188_v13 = vcvt.f32.s32 %v3195_v20 }
 0x2c2   : > { %v1022_v39 = vadd.s32 %v1021_v58, %v1019_v0  ;;  %v1036_v19 = vadd.s32 %v1035_v60, %v1033_v1  ;;  %2259 = vmatprep.mubr.msk.f32.mxu1 %vm1313_vm2, %v2478_v32  ;;  %v1147_v60 = vshll.u32 %v1146_v49, 16  ;;  %v1175_v1 = vshll.u32 %v1174_v46, 16 }
 0x2c3   : > { %v1046_v28 = vpop.xlane.xlu1 %1045  ;;  %v1060_v57 = vpop.xlane.xlu0 %1059 }
 0x2c4   : > { %1804 = vst.msk [vmem:[%s3245_s11 + $0x58] sm:$0xff] %vm1792_vm6, %v1022_v39  ;;  %1805 = vst.msk [vmem:[%s3245_s11 + $0x60] sm:$0xff] %vm1792_vm6, %v1036_v19  ;;  %v1047_v12 = vcvt.f32.s32 %v1046_v28  ;;  %v1061_v17 = vcvt.f32.s32 %v1060_v57  ;;  %vm1314_vm3 = vcmp.eq.s32.totalorder %v3658_v36, %v1022_v39  ;;  %vm1315_vm4 = vcmp.eq.s32.totalorder %v3659_v42, %v1036_v19 }
 0x2c5   : > { %2260 = vmatmul.mubr.msk.f32.gmra.mrb[4].mxu1 %vm1314_vm3, %v2478_v32  ;;  %v1202_v39 = vcvt.f32.s32 %v3197_v4  ;;  %v1189_v4 = vshll.u32 %v1188_v13, 16  ;;  %v1230_v28 = vcvt.f32.s32 %v3207_v3  ;;  %v1217_v3 = vshll.u32 %v1216_v6, 16  ;;  %v2383_v13 = vld [vmem:[%s2573_s15] sm:$0xff] }
 0x2c6   : > { %v1050_v22 = vadd.s32 %v1049_v26, %v1047_v12  ;;  %v1064_v50 = vadd.s32 %v1063_v47, %v1061_v17  ;;  %2262 = vmatprep.mubr.msk.f32.mxu1 %vm1315_vm4, %v2478_v32  ;;  %v1244_v42 = vcvt.f32.s32 %v3215_v10 }
 0x2c7   : > { %v1074_v61 = vpop.xlane.xlu1 %1073  ;;  %v1088_v18 = vpop.xlane.xlu0 %1087  ;;  %v1203_v7 = vshll.u32 %v1202_v39, 16  ;;  %v1231_v36 = vshll.u32 %v1230_v28, 16 }
 0x2c8   : > { %1806 = vst.msk [vmem:[%s3245_s11 + $0x68] sm:$0xff] %vm1792_vm6, %v1050_v22  ;;  %1807 = vst.msk [vmem:[%s3245_s11 + $0x70] sm:$0xff] %vm1792_vm6, %v1064_v50  ;;  %v1075_v8 = vcvt.f32.s32 %v1074_v61  ;;  %v1089_v52 = vcvt.f32.s32 %v1088_v18  ;;  %vm1316_vm5 = vcmp.eq.s32.totalorder %v2879_v41, %v1050_v22  ;;  %vm1317_vm7 = vcmp.eq.s32.totalorder %v2882_v51, %v1064_v50 }
 0x2c9   : > { %2263 = vmatmul.mubr.msk.f32.gmra.mrb[6].mxu1 %vm1316_vm5, %v2478_v32  ;;  %v1258_v22 = vcvt.f32.s32 %v3217_v11  ;;  %v1245_v11 = vshll.u32 %v1244_v42, 16  ;;  %v1286_v61 = vcvt.f32.s32 %v3227_v31  ;;  %v1273_v31 = vshll.u32 %v1272_v29, 16 }
 0x2ca   : > { %v1078_v14 = vadd.s32 %v1077_v37, %v1075_v8  ;;  %v1092_v59 = vadd.s32 %v1091_v53, %v1089_v52  ;;  %2265 = vmatprep.mubr.msk.f32.mxu1 %vm1317_vm7, %v2478_v32  ;;  %v3660_v52 = vld [vmem:[#allocation14_spill] sm:$0xff] }
 0x2cb   : > { %v1102_v27 = vpop.xlane.xlu1 %1101  ;;  %v1116_v45 = vpop.xlane.xlu0 %1115  ;;  %v1259_v21 = vshll.u32 %v1258_v22, 16 }
 0x2cc   : > { %1808 = vst.msk [vmem:[%s3245_s11 + $0x78] sm:$0xff] %vm1792_vm6, %v1078_v14  ;;  %1809 = vst.msk [vmem:[%s3245_s11 + $0x80] sm:$0xff] %vm1792_vm6, %v1092_v59  ;;  %v1103_v41 = vcvt.f32.s32 %v1102_v27  ;;  %v1117_v51 = vcvt.f32.s32 %v1116_v45  ;;  %vm1318_vm8 = vcmp.eq.s32.totalorder %v2895_v2, %v1078_v14  ;;  %vm1319_vm9 = vcmp.eq.s32.totalorder %v2898_v62, %v1092_v59  ;;  %v3661_v14 = vld [vmem:[#allocation15_spill] sm:$0xff] }
 0x2cd   : > { %2266 = vmatmul.mubr.msk.f32.gmra.mrb[8].mxu1 %vm1318_vm8, %v2478_v32 }
 0x2ce   : > { %v1106_v58 = vadd.s32 %v1105_v25, %v1103_v41  ;;  %v1120_v9 = vadd.s32 %v1119_v43, %v1117_v51  ;;  %2268 = vmatprep.mubr.msk.f32.mxu1 %vm1319_vm9, %v2478_v32  ;;  %v1287_v25 = vshll.u32 %v1286_v61, 16  ;;  %v3662_v43 = vld [vmem:[#allocation11_spill] sm:$0xff]  ;;  %v3663_v51 = vld [vmem:[#allocation18_spill] sm:$0xff]  ;;  %v2389_v61 = vld [vmem:[%s2573_s15 + $0x30] sm:$0xff] }
 0x2cf   : > { %v1130_v30 = vpop.xlane.xlu1 %1129  ;;  %v1144_v38 = vpop.xlane.xlu0 %1143  ;;  %v1300_v48 = vcvt.f32.s32 %v3662_v43 }
 0x2d0   : > { %1810 = vst.msk [vmem:[%s3245_s11 + $0x88] sm:$0xff] %vm1792_vm6, %v1106_v58  ;;  %1811 = vst.msk [vmem:[%s3245_s11 + $0x90] sm:$0xff] %vm1792_vm6, %v1120_v9  ;;  %v1131_v2 = vcvt.f32.s32 %v1130_v30  ;;  %v1145_v62 = vcvt.f32.s32 %v1144_v38  ;;  %vm1320_vm10 = vcmp.eq.s32.totalorder %v2911_v24, %v1106_v58  ;;  %vm1321_vm11 = vcmp.eq.s32.totalorder %v2914_v5, %v1120_v9  ;;  %v3664_v58 = vld [vmem:[#allocation19_spill] sm:$0xff]  ;;  %v3665_v30 = vld [vmem:[#allocation22_spill] sm:$0xff] }
 0x2d1   : > { %2269 = vmatmul.mubr.msk.f32.gmra.mrb[10].mxu1 %vm1320_vm10, %v2478_v32  ;;  %v1301_v15 = vshll.u32 %v1300_v48, 16  ;;  %v3666_v38 = vld [vmem:[#allocation23_spill] sm:$0xff] }
 0x2d2   : > { %v1134_v0 = vadd.s32 %v1133_v40, %v1131_v2  ;;  %v1148_v44 = vadd.s32 %v1147_v60, %v1145_v62  ;;  %2271 = vmatprep.mubr.msk.f32.mxu1 %vm1321_vm11, %v2478_v32  ;;  %v3667_v62 = vld [vmem:[#allocation26_spill] sm:$0xff]  ;;  %v2391_v48 = vld [vmem:[%s2573_s15 + $0x40] sm:$0xff] }
 0x2d3   : > { %v1158_v19 = vpop.xlane.xlu1 %1157  ;;  %v1172_v26 = vpop.xlane.xlu0 %1171 }
 0x2d4   : > { %1812 = vst.msk [vmem:[%s3245_s11 + $0x98] sm:$0xff] %vm1792_vm6, %v1134_v0  ;;  %1813 = vst.msk [vmem:[%s3245_s11 + $0xa0] sm:$0xff] %vm1792_vm6, %v1148_v44  ;;  %v1159_v24 = vcvt.f32.s32 %v1158_v19  ;;  %v1173_v5 = vcvt.f32.s32 %v1172_v26  ;;  %vm1322_vm12 = vcmp.eq.s32.totalorder %v2927_v54, %v1134_v0  ;;  %vm1323_vm13 = vcmp.eq.s32.totalorder %v2930_v16, %v1148_v44  ;;  %v2382_v44 = vld [vmem:[%s2573_s15 + $0x8] sm:$0xff] }
 0x2d5   : > { %2272 = vmatmul.mubr.msk.f32.gmra.mrb[12].mxu1 %vm1322_vm12, %v2478_v32 }
 0x2d6   : > { %v1162_v47 = vadd.s32 %v1161_v55, %v1159_v24  ;;  %v1176_v20 = vadd.s32 %v1175_v1, %v1173_v5  ;;  %2274 = vmatprep.mubr.msk.f32.mxu1 %vm1323_vm13, %v2478_v32  ;;  %v2384_v5 = vld [vmem:[%s2573_s15 + $0x18] sm:$0xff] }
 0x2d7   : > { %v1186_v57 = vpop.xlane.xlu1 %1185  ;;  %v1200_v12 = vpop.xlane.xlu0 %1199 }
 0x2d8   : > { %1814 = vst.msk [vmem:[%s3245_s11 + $0xa8] sm:$0xff] %vm1792_vm6, %v1162_v47  ;;  %1815 = vst.msk [vmem:[%s3245_s11 + $0xb0] sm:$0xff] %vm1792_vm6, %v1176_v20  ;;  %v1187_v54 = vcvt.f32.s32 %v1186_v57  ;;  %v1201_v16 = vcvt.f32.s32 %v1200_v12  ;;  %vm1324_vm14 = vcmp.eq.s32.totalorder %v2943_v63, %v1162_v47  ;;  %vm1325_vm15 = vcmp.eq.s32.totalorder %v2946_v23, %v1176_v20 }
 0x2d9   : > { %2275 = vmatmul.mubr.msk.f32.gmra.mrb[14].mxu1 %vm1324_vm14, %v2478_v32 }
 0x2da   : > { %v1190_v17 = vadd.s32 %v1189_v4, %v1187_v54  ;;  %v1204_v35 = vadd.s32 %v1203_v7, %v1201_v16  ;;  %2277 = vmatprep.mubr.msk.f32.mxu1 %vm1325_vm15, %v2478_v32  ;;  %v2385_v7 = vld [vmem:[%s2573_s15 + $0x10] sm:$0xff]  ;;  %v2386_v16 = vld [vmem:[%s2573_s15 + $0x28] sm:$0xff] }
 0x2db   : > { %v1214_v50 = vpop.xlane.xlu1 %1213  ;;  %v1228_v37 = vpop.xlane.xlu0 %1227 }
 0x2dc   : > { %1816 = vst.msk [vmem:[%s3245_s11 + $0xb8] sm:$0xff] %vm1792_vm6, %v1190_v17  ;;  %1817 = vst.msk [vmem:[%s3245_s11 + $0xc0] sm:$0xff] %vm1792_vm6, %v1204_v35  ;;  %v1215_v63 = vcvt.f32.s32 %v1214_v50  ;;  %v1229_v23 = vcvt.f32.s32 %v1228_v37  ;;  %vm1326_vm0 = vcmp.eq.s32.totalorder %v2959_v56, %v1190_v17  ;;  %vm1327_vm2 = vcmp.eq.s32.totalorder %v2962_v34, %v1204_v35 }
 0x2dd   : > { %2278 = vmatmul.mubr.msk.f32.gmra.mrb[16].mxu1 %vm1326_vm0, %v2478_v32 }
 0x2de   : > { %v1218_v53 = vadd.s32 %v1217_v3, %v1215_v63  ;;  %v1232_v10 = vadd.s32 %v1231_v36, %v1229_v23  ;;  %2280 = vmatprep.mubr.msk.f32.mxu1 %vm1327_vm2, %v2478_v32  ;;  %v2387_v36 = vld [vmem:[%s2573_s15 + $0x20] sm:$0xff] }
 0x2df   : > { %v1242_v18 = vpop.xlane.xlu1 %1241  ;;  %v1256_v8 = vpop.xlane.xlu0 %1255 }
 0x2e0   : > { %1818 = vst.msk [vmem:[%s3245_s11 + $0xc8] sm:$0xff] %vm1792_vm6, %v1218_v53  ;;  %1819 = vst.msk [vmem:[%s3245_s11 + $0xd0] sm:$0xff] %vm1792_vm6, %v1232_v10  ;;  %v1243_v56 = vcvt.f32.s32 %v1242_v18  ;;  %v1257_v34 = vcvt.f32.s32 %v1256_v8  ;;  %vm1328_vm3 = vcmp.eq.s32.totalorder %v3660_v52, %v1218_v53  ;;  %vm1329_vm4 = vcmp.eq.s32.totalorder %v3661_v14, %v1232_v10  ;;  %v2388_v10 = vld [vmem:[%s2573_s15 + $0x38] sm:$0xff] }
 0x2e1   : > { %2281 = vmatmul.mubr.msk.f32.gmra.mrb[18].mxu1 %vm1328_vm3, %v2478_v32 }
 0x2e2   : > { %v1246_v59 = vadd.s32 %v1245_v11, %v1243_v56  ;;  %v1260_v33 = vadd.s32 %v1259_v21, %v1257_v34  ;;  %2283 = vmatprep.mubr.msk.f32.mxu1 %vm1329_vm4, %v2478_v32 }
 0x2e3   : > { %v1270_v49 = vpop.xlane.xlu1 %1269  ;;  %v1284_v27 = vpop.xlane.xlu0 %1283 }
 0x2e4   : > { %1820 = vst.msk [vmem:[%s3245_s11 + $0xd8] sm:$0xff] %vm1792_vm6, %v1246_v59  ;;  %1821 = vst.msk [vmem:[%s3245_s11 + $0xe0] sm:$0xff] %vm1792_vm6, %v1260_v33  ;;  %v1271_v45 = vcvt.f32.s32 %v1270_v49  ;;  %v1285_v41 = vcvt.f32.s32 %v1284_v27  ;;  %vm1330_vm5 = vcmp.eq.s32.totalorder %v3663_v51, %v1246_v59  ;;  %vm1331_vm7 = vcmp.eq.s32.totalorder %v3664_v58, %v1260_v33  ;;  %v2390_v33 = vld [vmem:[%s2573_s15 + $0x48] sm:$0xff] }
 0x2e5   : > { %2284 = vmatmul.mubr.msk.f32.gmra.mrb[20].mxu1 %vm1330_vm5, %v2478_v32 }
 0x2e6   : > { %v1274_v9 = vadd.s32 %v1273_v31, %v1271_v45  ;;  %v1288_v40 = vadd.s32 %v1287_v25, %v1285_v41  ;;  %2286 = vmatprep.mubr.msk.f32.mxu1 %vm1331_vm7, %v2478_v32 }
 0x2e7   : > { %v1298_v60 = vpop.xlane.xlu1 %1297 }
 0x2e8   : > { %1822 = vst.msk [vmem:[%s3245_s11 + $0xe8] sm:$0xff] %vm1792_vm6, %v1274_v9  ;;  %1823 = vst.msk [vmem:[%s3245_s11 + $0xf0] sm:$0xff] %vm1792_vm6, %v1288_v40  ;;  %v1299_v46 = vcvt.f32.s32 %v1298_v60  ;;  %vm1332_vm8 = vcmp.eq.s32.totalorder %v3665_v30, %v1274_v9  ;;  %vm1333_vm9 = vcmp.eq.s32.totalorder %v3666_v38, %v1288_v40  ;;  %v2392_v40 = vld [vmem:[%s2573_s15 + $0x58] sm:$0xff]  ;;  %v2393_v30 = vld [vmem:[%s2573_s15 + $0x50] sm:$0xff] }
 0x2e9   : > { %2287 = vmatmul.mubr.msk.f32.gmra.mrb[22].mxu1 %vm1332_vm8, %v2478_v32 }
 0x2ea   : > { %v1302_v2 = vadd.s32 %v1301_v15, %v1299_v46  ;;  %2289 = vmatprep.mubr.msk.f32.mxu1 %vm1333_vm9, %v2478_v32 }
 0x2ec   : > { %1824 = vst.msk [vmem:[%s3245_s11 + $0xf8] sm:$0xff] %vm1792_vm6, %v1302_v2  ;;  %vm1334_vm10 = vcmp.eq.s32.totalorder %v3667_v62, %v1302_v2  ;;  %s2418_s11 = sshll.u32 %s2479_s25, 4  ;;  %s2419_s11 = int_to_ptr.vmem [resolvable:$false] %s2418_s11 }
 0x2ed   : > { %2290 = vmatmul.mubr.msk.f32.gmra.mrb[24].mxu1 %vm1334_vm10, %v2478_v32  ;;  %s2420_s13 = scalar_lea.vmem %s2419_s11, 256 }
 0x384   : > { %v2246_v0 = vpop.f32.mrb[32].mxu0 }
 0x385   : > { %v1625_v55 = vsub.f32 %v2246_v0, %v2382_v44  ;;  %1761 = vst.msk [vmem:[%s3408_s16 + $0x8] sm:$0xff] %vm329_vm1, %v2246_v0  ;;  %v1465_v1 = vpop.f32.mrb[33].mxu0 }
 0x386   : > { %v1624_v39 = vsub.f32 %v1465_v1, %v2383_v13  ;;  %1760 = vst.msk [vmem:[%s3408_s16] sm:$0xff] %vm329_vm1, %v1465_v1  ;;  %v2394_v13 = vld [vmem:[%s2573_s15 + $0x68] sm:$0xff] }
 0x387   : > { %v1657_v32 = vmul.f32 %v1625_v55, %v1625_v55 }
 0x388   : > { %v1656_v19 = vmul.f32 %v1624_v39, %v1624_v39  ;;  %v2249_v26 = vpop.f32.mrb[34].mxu0 }
 0x389   : > { %v1689_v24 = vsel %vm329_vm1, %v1657_v32, 0.0  ;;  %v1627_v47 = vsub.f32 %v2249_v26, %v2384_v5  ;;  %1763 = vst.msk [vmem:[%s3408_s16 + $0x18] sm:$0xff] %vm329_vm1, %v2249_v26  ;;  %v1475_v20 = vpop.f32.mrb[35].mxu0  ;;  %v2395_v26 = vld [vmem:[%s2573_s15 + $0x60] sm:$0xff] }
 0x38a   : > { %v1688_v4 = vsel %vm329_vm1, %v1656_v19, 0.0  ;;  %v1626_v6 = vsub.f32 %v1475_v20, %v2385_v7  ;;  %1762 = vst.msk [vmem:[%s3408_s16 + $0x10] sm:$0xff] %vm329_vm1, %v1475_v20 }
 0x38b   : > { %v1690_v28 = vadd.f32 %v1689_v24, %v1688_v4  ;;  %v1659_v57 = vmul.f32 %v1627_v47, %v1627_v47 }
 0x38c   : > { %v1658_v12 = vmul.f32 %v1626_v6, %v1626_v6  ;;  %v2252_v54 = vpop.f32.mrb[36].mxu0 }
 0x38d   : > { %v1629_v17 = vsub.f32 %v2252_v54, %v2386_v16  ;;  %1765 = vst.msk [vmem:[%s3408_s16 + $0x28] sm:$0xff] %vm329_vm1, %v2252_v54  ;;  %v1485_v35 = vpop.f32.mrb[37].mxu0  ;;  %v1693_v50 = vsel %vm329_vm1, %v1659_v57, 0.0  ;;  %v2397_v16 = vld [vmem:[%s2573_s15 + $0x70] sm:$0xff] }
 0x38e   : > { %v1691_v3 = vsel %vm329_vm1, %v1658_v12, 0.0  ;;  %v1628_v42 = vsub.f32 %v1485_v35, %v2387_v36  ;;  %1764 = vst.msk [vmem:[%s3408_s16 + $0x20] sm:$0xff] %vm329_vm1, %v1485_v35 }
 0x38f   : > { %v1692_v22 = vadd.f32 %v1691_v3, %v1690_v28  ;;  %v1661_v37 = vmul.f32 %v1629_v17, %v1629_v17  ;;  %v2396_v28 = vld [vmem:[%s2573_s15 + $0x78] sm:$0xff] }
 0x390   : > { %v1660_v63 = vmul.f32 %v1628_v42, %v1628_v42  ;;  %v2255_v23 = vpop.f32.mrb[0].mxu1 }
 0x391   : > { %v1694_v53 = vadd.f32 %v1693_v50, %v1692_v22  ;;  %v1631_v11 = vsub.f32 %v2255_v23, %v2388_v10  ;;  %1767 = vst.msk [vmem:[%s3408_s16 + $0x38] sm:$0xff] %vm329_vm1, %v2255_v23  ;;  %v1495_v21 = vpop.f32.mrb[1].mxu1  ;;  %v1697_v56 = vsel %vm329_vm1, %v1661_v37, 0.0  ;;  %v2398_v37 = vld [vmem:[%s2573_s15 + $0x88] sm:$0xff]  ;;  %v2399_v10 = vld [vmem:[%s2573_s15 + $0x80] sm:$0xff] }
 0x392   : > { %v1695_v29 = vsel %vm329_vm1, %v1660_v63, 0.0  ;;  %v1630_v18 = vsub.f32 %v1495_v21, %v2389_v61  ;;  %1766 = vst.msk [vmem:[%s3408_s16 + $0x30] sm:$0xff] %vm329_vm1, %v1495_v21 }
 0x393   : > { %v1696_v8 = vadd.f32 %v1695_v29, %v1694_v53  ;;  %v1663_v34 = vmul.f32 %v1631_v11, %v1631_v11 }
 0x394   : > { %v1662_v52 = vmul.f32 %v1630_v18, %v1630_v18  ;;  %v2258_v14 = vpop.f32.mrb[2].mxu1 }
 0x395   : > { %v1698_v59 = vadd.f32 %v1697_v56, %v1696_v8  ;;  %v1633_v31 = vsub.f32 %v2258_v14, %v2390_v33  ;;  %1769 = vst.msk [vmem:[%s3408_s16 + $0x48] sm:$0xff] %vm329_vm1, %v2258_v14  ;;  %v1505_v25 = vpop.f32.mrb[3].mxu1  ;;  %v1701_v45 = vsel %vm329_vm1, %v1663_v34, 0.0  ;;  %v2400_v34 = vld [vmem:[%s2573_s15 + $0x98] sm:$0xff]  ;;  %v2401_v33 = vld [vmem:[%s2573_s15 + $0x90] sm:$0xff] }
 0x396   : > { %v1699_v43 = vsel %vm329_vm1, %v1662_v52, 0.0  ;;  %v1632_v49 = vsub.f32 %v1505_v25, %v2391_v48  ;;  %1768 = vst.msk [vmem:[%s3408_s16 + $0x40] sm:$0xff] %vm329_vm1, %v1505_v25 }
 0x397   : > { %v1700_v27 = vadd.f32 %v1699_v43, %v1698_v59  ;;  %v1665_v41 = vmul.f32 %v1633_v31, %v1633_v31 }
 0x398   : > { %v1664_v51 = vmul.f32 %v1632_v49, %v1632_v49  ;;  %v2261_v58 = vpop.f32.mrb[4].mxu1 }
 0x399   : > { %v1702_v9 = vadd.f32 %v1701_v45, %v1700_v27  ;;  %v1635_v60 = vsub.f32 %v2261_v58, %v2392_v40  ;;  %1771 = vst.msk [vmem:[%s3408_s16 + $0x58] sm:$0xff] %vm329_vm1, %v2261_v58  ;;  %v1515_v15 = vpop.f32.mrb[5].mxu1  ;;  %v1705_v62 = vsel %vm329_vm1, %v1665_v41, 0.0  ;;  %v2402_v41 = vld [vmem:[%s2573_s15 + $0xa8] sm:$0xff]  ;;  %v2403_v40 = vld [vmem:[%s2573_s15 + $0xa0] sm:$0xff] }
 0x39a   : > { %v1703_v46 = vsel %vm329_vm1, %v1664_v51, 0.0  ;;  %v1634_v38 = vsub.f32 %v1515_v15, %v2393_v30  ;;  %1770 = vst.msk [vmem:[%s3408_s16 + $0x50] sm:$0xff] %vm329_vm1, %v1515_v15 }
 0x39b   : > { %v1704_v2 = vadd.f32 %v1703_v46, %v1702_v9  ;;  %v1667_v0 = vmul.f32 %v1635_v60, %v1635_v60 }
 0x39c   : > { %v1666_v44 = vmul.f32 %v1634_v38, %v1634_v38  ;;  %v2264_v55 = vpop.f32.mrb[6].mxu1 }
 0x39d   : > { %v1706_v1 = vadd.f32 %v1705_v62, %v1704_v2  ;;  %v1637_v39 = vsub.f32 %v2264_v55, %v2394_v13  ;;  %1773 = vst.msk [vmem:[%s3408_s16 + $0x68] sm:$0xff] %vm329_vm1, %v2264_v55  ;;  %v1525_v32 = vpop.f32.mrb[7].mxu1  ;;  %v1709_v47 = vsel %vm329_vm1, %v1667_v0, 0.0  ;;  %v2404_v0 = vld [vmem:[%s2573_s15 + $0xb8] sm:$0xff]  ;;  %v2405_v13 = vld [vmem:[%s2573_s15 + $0xb0] sm:$0xff] }
 0x39e   : > { %v1707_v19 = vsel %vm329_vm1, %v1666_v44, 0.0  ;;  %v1636_v24 = vsub.f32 %v1525_v32, %v2395_v26  ;;  %1772 = vst.msk [vmem:[%s3408_s16 + $0x60] sm:$0xff] %vm329_vm1, %v1525_v32 }
 0x39f   : > { %v1708_v5 = vadd.f32 %v1707_v19, %v1706_v1  ;;  %v1669_v20 = vmul.f32 %v1637_v39, %v1637_v39 }
 0x3a0   : > { %v1668_v4 = vmul.f32 %v1636_v24, %v1636_v24  ;;  %v2267_v7 = vpop.f32.mrb[8].mxu1 }
 0x3a1   : > { %v1710_v6 = vadd.f32 %v1709_v47, %v1708_v5  ;;  %v1639_v57 = vsub.f32 %v2267_v7, %v2396_v28  ;;  %1775 = vst.msk [vmem:[%s3408_s16 + $0x78] sm:$0xff] %vm329_vm1, %v2267_v7  ;;  %v1535_v12 = vpop.f32.mrb[9].mxu1  ;;  %v1713_v3 = vsel %vm329_vm1, %v1669_v20, 0.0  ;;  %v2406_v20 = vld [vmem:[%s2573_s15 + $0xc8] sm:$0xff]  ;;  %v2407_v28 = vld [vmem:[%s2573_s15 + $0xc0] sm:$0xff] }
 0x3a2   : > { %v1711_v54 = vsel %vm329_vm1, %v1668_v4, 0.0  ;;  %v1638_v17 = vsub.f32 %v1535_v12, %v2397_v16  ;;  %1774 = vst.msk [vmem:[%s3408_s16 + $0x70] sm:$0xff] %vm329_vm1, %v1535_v12 }
 0x3a3   : > { %v1712_v35 = vadd.f32 %v1711_v54, %v1710_v6  ;;  %v1671_v36 = vmul.f32 %v1639_v57, %v1639_v57 }
 0x3a4   : > { %v1670_v42 = vmul.f32 %v1638_v17, %v1638_v17  ;;  %v2270_v22 = vpop.f32.mrb[10].mxu1 }
 0x3a5   : > { %v1714_v50 = vadd.f32 %v1713_v3, %v1712_v35  ;;  %v1641_v63 = vsub.f32 %v2270_v22, %v2398_v37  ;;  %1777 = vst.msk [vmem:[%s3408_s16 + $0x88] sm:$0xff] %vm329_vm1, %v2270_v22  ;;  %v1545_v23 = vpop.f32.mrb[11].mxu1  ;;  %v1717_v29 = vsel %vm329_vm1, %v1671_v36, 0.0  ;;  %v2408_v36 = vld [vmem:[%s2573_s15 + $0xd8] sm:$0xff]  ;;  %v2409_v37 = vld [vmem:[%s2573_s15 + $0xd0] sm:$0xff] }
 0x3a6   : > { %v1715_v53 = vsel %vm329_vm1, %v1670_v42, 0.0  ;;  %v1640_v11 = vsub.f32 %v1545_v23, %v2399_v10  ;;  %1776 = vst.msk [vmem:[%s3408_s16 + $0x80] sm:$0xff] %vm329_vm1, %v1545_v23 }
 0x3a7   : > { %v1716_v21 = vadd.f32 %v1715_v53, %v1714_v50  ;;  %v1673_v61 = vmul.f32 %v1641_v63, %v1641_v63 }
 0x3a8   : > { %v1672_v18 = vmul.f32 %v1640_v11, %v1640_v11  ;;  %v2273_v8 = vpop.f32.mrb[12].mxu1 }
 0x3a9   : > { %v1718_v56 = vadd.f32 %v1717_v29, %v1716_v21  ;;  %v1643_v52 = vsub.f32 %v2273_v8, %v2400_v34  ;;  %1779 = vst.msk [vmem:[%s3408_s16 + $0x98] sm:$0xff] %vm329_vm1, %v2273_v8  ;;  %v1555_v14 = vpop.f32.mrb[13].mxu1  ;;  %v1721_v43 = vsel %vm329_vm1, %v1673_v61, 0.0  ;;  %v2410_v61 = vld [vmem:[%s2573_s15 + $0xe8] sm:$0xff]  ;;  %v2411_v34 = vld [vmem:[%s2573_s15 + $0xe0] sm:$0xff] }
 0x3aa   : > { %v1719_v59 = vsel %vm329_vm1, %v1672_v18, 0.0  ;;  %v1642_v31 = vsub.f32 %v1555_v14, %v2401_v33  ;;  %1778 = vst.msk [vmem:[%s3408_s16 + $0x90] sm:$0xff] %vm329_vm1, %v1555_v14 }
 0x3ab   : > { %v1720_v25 = vadd.f32 %v1719_v59, %v1718_v56  ;;  %v1675_v48 = vmul.f32 %v1643_v52, %v1643_v52 }
 0x3ac   : > { %v1674_v49 = vmul.f32 %v1642_v31, %v1642_v31  ;;  %v2276_v27 = vpop.f32.mrb[14].mxu1 }
 0x3ad   : > { %v1722_v45 = vadd.f32 %v1721_v43, %v1720_v25  ;;  %v1645_v51 = vsub.f32 %v2276_v27, %v2402_v41  ;;  %1781 = vst.msk [vmem:[%s3408_s16 + $0xa8] sm:$0xff] %vm329_vm1, %v2276_v27  ;;  %v1565_v58 = vpop.f32.mrb[15].mxu1  ;;  %v1725_v46 = vsel %vm329_vm1, %v1675_v48, 0.0  ;;  %v2412_v48 = vld [vmem:[%s2573_s15 + $0xf8] sm:$0xff]  ;;  %v2413_v41 = vld [vmem:[%s2573_s15 + $0xf0] sm:$0xff]  ;;  %s1972_s15 = sshll.u32 %s258_s12, 3 }
 0x3ae   : > { %v1723_v9 = vsel %vm329_vm1, %v1674_v49, 0.0  ;;  %v1644_v60 = vsub.f32 %v1565_v58, %v2403_v40  ;;  %1780 = vst.msk [vmem:[%s3408_s16 + $0xa0] sm:$0xff] %vm329_vm1, %v1565_v58  ;;  %s260_s17 = scalar_lea.vmem [#allocation2], %s1972_s15 }
 0x3af   : > { %v1724_v15 = vadd.f32 %v1723_v9, %v1722_v45  ;;  %v1677_v30 = vmul.f32 %v1645_v51, %v1645_v51  ;;  %s1859_s18 = sshll.u32 %s260_s17, 4  ;;  %s3540_s18 = int_to_ptr.vmem [resolvable:$true] %s1859_s18 }
 0x3b0   : > { %v1676_v38 = vmul.f32 %v1644_v60, %v1644_v60  ;;  %v2279_v2 = vpop.f32.mrb[16].mxu1  ;;  %s2414_s10 = scalar_lea.vmem %s3540_s18, 128  ;;  %p2421_p0 = scmp.lt.s32.totalorder %s3540_s18, %s2419_s11 }
 0x3b1   : > { %v1726_v62 = vadd.f32 %v1725_v46, %v1724_v15  ;;  %v1647_v44 = vsub.f32 %v2279_v2, %v2404_v0  ;;  %1783 = vst.msk [vmem:[%s3408_s16 + $0xb8] sm:$0xff] %vm329_vm1, %v2279_v2  ;;  %v1575_v55 = vpop.f32.mrb[17].mxu1  ;;  %v1729_v19 = vsel %vm329_vm1, %v1677_v30, 0.0  ;;  %p2415_p11 = scmp.ne.s32.totalorder %s3540_s18, %s2414_s10  ;;  %p2422_p1 = scmp.lt.s32.totalorder %s2420_s13, %s2414_s10 }
 0x3b2   : > { %v1727_v1 = vsel %vm329_vm1, %v1676_v38, 0.0  ;;  %v1646_v39 = vsub.f32 %v1575_v55, %v2405_v13  ;;  %1782 = vst.msk [vmem:[%s3408_s16 + $0xb0] sm:$0xff] %vm329_vm1, %v1575_v55 }
 0x3b3   : > { %v1728_v32 = vadd.f32 %v1727_v1, %v1726_v62  ;;  %v1679_v26 = vmul.f32 %v1647_v44, %v1647_v44  ;;  %p2416_p12 = pnand %p2415_p11, %p2553_p5  ;;  %p2423_p2 = por %p2422_p1, %p2421_p0 }
 0x3b4   : > { %v1678_v24 = vmul.f32 %v1646_v39, %v1646_v39  ;;  %v2282_v5 = vpop.f32.mrb[18].mxu1 }
 0x3b5   : > { %v1730_v47 = vadd.f32 %v1729_v19, %v1728_v32  ;;  %v1649_v4 = vsub.f32 %v2282_v5, %v2406_v20  ;;  %1785 = vst.msk [vmem:[%s3408_s16 + $0xc8] sm:$0xff] %vm329_vm1, %v2282_v5  ;;  %v1585_v7 = vpop.f32.mrb[19].mxu1  ;;  %v1733_v54 = vsel %vm329_vm1, %v1679_v26, 0.0  ;;  %p2417_p13 = pneg %p2416_p12 }
 0x3b6   : > { %v1731_v6 = vsel %vm329_vm1, %v1678_v24, 0.0  ;;  %v1648_v57 = vsub.f32 %v1585_v7, %v2407_v28  ;;  %1784 = vst.msk [vmem:[%s3408_s16 + $0xc0] sm:$0xff] %vm329_vm1, %v1585_v7 }
 0x3b7   : > { %v1732_v12 = vadd.f32 %v1731_v6, %v1730_v47  ;;  %v1681_v16 = vmul.f32 %v1649_v4, %v1649_v4  ;;  %p2424_p3 = pnand %p2423_p2, %p2417_p13 }
 0x3b8   : > { %v1680_v17 = vmul.f32 %v1648_v57, %v1648_v57  ;;  %v2285_v35 = vpop.f32.mrb[20].mxu1 }
 0x3b9   : > { %v1734_v3 = vadd.f32 %v1733_v54, %v1732_v12  ;;  %v1651_v42 = vsub.f32 %v2285_v35, %v2408_v36  ;;  %1787 = vst.msk [vmem:[%s3408_s16 + $0xd8] sm:$0xff] %vm329_vm1, %v2285_v35  ;;  %v1595_v22 = vpop.f32.mrb[21].mxu1  ;;  %v1737_v53 = vsel %vm329_vm1, %v1681_v16, 0.0 }
 0x3ba   : > { %v1735_v50 = vsel %vm329_vm1, %v1680_v17, 0.0  ;;  %v1650_v63 = vsub.f32 %v1595_v22, %v2409_v37  ;;  %1786 = vst.msk [vmem:[%s3408_s16 + $0xd0] sm:$0xff] %vm329_vm1, %v1595_v22 }
 0x3bb   : > { %v1736_v23 = vadd.f32 %v1735_v50, %v1734_v3  ;;  %v1683_v10 = vmul.f32 %v1651_v42, %v1651_v42 }
 0x3bc   : > { %v1682_v11 = vmul.f32 %v1650_v63, %v1650_v63  ;;  %v2288_v21 = vpop.f32.mrb[22].mxu1 }
 0x3bd   : > { %v1738_v29 = vadd.f32 %v1737_v53, %v1736_v23  ;;  %v1653_v18 = vsub.f32 %v2288_v21, %v2410_v61  ;;  %1789 = vst.msk [vmem:[%s3408_s16 + $0xe8] sm:$0xff] %vm329_vm1, %v2288_v21  ;;  %v1605_v8 = vpop.f32.mrb[23].mxu1  ;;  %v1741_v59 = vsel %vm329_vm1, %v1683_v10, 0.0 }
 0x3be   : > { %v1739_v56 = vsel %vm329_vm1, %v1682_v11, 0.0  ;;  %v1652_v52 = vsub.f32 %v1605_v8, %v2411_v34  ;;  %1788 = vst.msk [vmem:[%s3408_s16 + $0xe0] sm:$0xff] %vm329_vm1, %v1605_v8 }
 0x3bf   : > { %v1740_v14 = vadd.f32 %v1739_v56, %v1738_v29  ;;  %v1685_v33 = vmul.f32 %v1653_v18, %v1653_v18 }
 0x3c0   : > { %v1684_v31 = vmul.f32 %v1652_v52, %v1652_v52  ;;  %v2291_v25 = vpop.f32.mrb[24].mxu1 }
 0x3c1   : > { %v1742_v43 = vadd.f32 %v1741_v59, %v1740_v14  ;;  %v1655_v49 = vsub.f32 %v2291_v25, %v2412_v48  ;;  %1791 = vst.msk [vmem:[%s3408_s16 + $0xf8] sm:$0xff] %vm329_vm1, %v2291_v25  ;;  %v1615_v27 = vpop.f32.mrb[25].mxu1  ;;  %v1745_v9 = vsel %vm329_vm1, %v1685_v33, 0.0 }
 0x3c2   : > { %v1743_v45 = vsel %vm329_vm1, %v1684_v31, 0.0  ;;  %v1654_v51 = vsub.f32 %v1615_v27, %v2413_v41  ;;  %1790 = vst.msk [vmem:[%s3408_s16 + $0xf0] sm:$0xff] %vm329_vm1, %v1615_v27 }
 0x3c3   : > { %v1744_v58 = vadd.f32 %v1743_v45, %v1742_v43  ;;  %v1687_v40 = vmul.f32 %v1655_v49, %v1655_v49 }
 0x3c4   : > { %v1686_v60 = vmul.f32 %v1654_v51, %v1654_v51 }
 0x3c5   : > { %v1746_v15 = vadd.f32 %v1745_v9, %v1744_v58  ;;  %v1749_v38 = vsel %vm329_vm1, %v1687_v40, 0.0 }
 0x3c6   : > { %v1747_v46 = vsel %vm329_vm1, %v1686_v60, 0.0 }
 0x3c7   : > { %v1748_v30 = vadd.f32 %v1747_v46, %v1746_v15 }
 0x3c9   : > { %v1750_v2 = vadd.f32 %v1749_v38, %v1748_v30 }
 0x3cb   : > { %1751 = vadd.xlane.f32.xlu0 %v1750_v2 }
 0x458   : > { %v1752_v62 = vpop.xlane.xlu0 %1751 }
 0x459   : > { %v1753_v0 = vrot.slane %v1752_v62, 4 }
 0x45b   : > { %v1754_v44 = vadd.f32 %v1753_v0, %v1752_v62 }
 0x45d   : > { %v1755_v55 = vrot.slane %v1754_v44, 2 }
 0x45f   : > { %v1756_v1 = vadd.f32 %v1755_v55, %v1754_v44 }
 0x461   : > { %v1757_v13 = vrot.slane %v1756_v1, 1 }
 0x463   : > { %v1758_v39 = vadd.f32 %v1757_v13, %v1756_v1 }
 0x465   : > { %2340 = vpush %v1758_v39 }
 0x496   : > { %s2341_s20 = spop %2340 }
 0x497   : > { %v1825_v32 = vstv %s2341_s20 }
 0x498   : > { %1826 = vst [vmem:[%s260_s17] sm:$0xff] %v1825_v32 }
 0x499   : > { %2427 = shalt.err (!%p2424_p3)
}
 0x49a   : > { %s2428_s14 = scalar_lea.hbm %s3545_s29, 128  ;;  %s2432_s15 = scalar_lea.hbm %s3591_s6, 256 }
 0x49b   : > { %p2429_p4 = scmp.ne.s32.totalorder %s3545_s29, %s2428_s14  ;;  %p2433_p9 = scmp.lt.u32.totalorder %s3545_s29, %s3591_s6 }
 0x49c   : > { %p2434_p10 = scmp.lt.u32.totalorder %s2432_s15, %s2428_s14  ;;  %p2436_p12 = scmp.lt.u32.totalorder %s2428_s14, %s3545_s29 }
 0x49d   : > { %p2430_p7 = pnand %p2429_p4, %p2553_p5 }
 0x49e   : > { %p2435_p11 = por %p2434_p10, %p2433_p9 }
 0x49f   : > { %p2431_p8 = pneg %p2430_p7 }
 0x4a0   : > { %p2437_p13 = por %p2436_p12, %p2435_p11 }
 0x4a2   : > { %p2438_p0 = pnand %p2437_p13, %p2431_p8 }
 0x4a4   : > { %2441 = shalt.err (!%p2438_p0)
}
 0x4a5   : > { %2342 = dma.vmem_to_hbm [thread:$0]  (%p2553_p5), %s3540_s18, 128, %s3545_s29, %s1838_s9  }
 0x4a6 PF: > { %p2348_p1 = scmp.ge.s32.totalorder %s2476_s24, 2  ;;  %s1887_s20 = sand.u32 1, %s2464_s21  }
 0x4a7   : > { %s1888_s26 = scalar_lea.sflag [#allocation3], %s1887_s20 }
 0x4a8   : > { %p2345_p2 = pnand %p2348_p1, %p2557_p6 }
 0x4aa   : > { %2459 = dma.done.wait (!%p2345_p2), %s1888_s26, 128  }
 0x4ab   : > { %2461 = vsyncadd (!%p2345_p2), %s1888_s26, 4294967168  ;;  %p17_p3 = scmp.ge.s32.totalorder %s2540_s27, 4   ;;  %s3668_s21 = smov %s2468_s22 }
 0x4ac   : > { %s3669_s22 = smov %s2472_s23  ;;  %s3670_s23 = smov %s2551_s30 }
 0x4ad   : > { %s3671_s24 = smov %s2540_s27  ;;  %19 = sbr.rel (!%p17_p3) target bundleno = 3 (0x3), region = 95 }
 0x4b4   :  { %1893 = vsyncpa [#allocation3], 1 }
 0x4b5   :  { %1895 = vsyncpa [#allocation3 + $0x1], 1 }

</bundles_post_ra>
